<compile_context>
chip_gen: v6e
topology: v6e:2x2x1
jax: 0.10.0
libtpu: 0.0.40
codegen_flags: <defaults>
</compile_context>

<pallas_src>
import functools

import jax
import jax.numpy as jnp
from jax.experimental import pallas as pl
from jax.experimental.pallas import tpu as pltpu

_MIB = 1024 * 1024


def _mha_kernel(x_ref, gamma_ref, beta_ref, w_qkv_ref, b_qkv_ref, wo_ref, bo_ref,
                o_ref, qkv_ref, ctx_ref, *, num_heads, head_dim, eps,
                batch_block, seq_len):
    dim = num_heads * head_dim
    rows = batch_block * seq_len

    # (Bb, S, D) -> (rows, D): merge of leading dims only (layout-trivial).
    x = x_ref[...].reshape(rows, dim)

    # ---- LayerNorm (f32 statistics, biased variance, eps inside rsqrt) ----
    mean = jnp.mean(x, axis=-1, keepdims=True)
    var = jnp.mean((x - mean) ** 2, axis=-1, keepdims=True)
    xn = (x - mean) * jax.lax.rsqrt(var + eps)
    xn = xn * gamma_ref[...] + beta_ref[...]                      # broadcast (1, D)

    # ---- Fused QKV projection: bf16 MXU matmul, f32 accumulation ----
    # (softmax scale is pre-folded into the Wq / bq columns by the wrapper)
    qkv = jnp.dot(xn.astype(jnp.bfloat16), w_qkv_ref[...],
                  preferred_element_type=jnp.float32) + b_qkv_ref[...]       # (rows, 3D) f32
    # Park the slab in bf16 VMEM scratch; heads load static slices of it, keeping the
    # statically-unrolled head loop from carrying a large SSA live range.
    qkv_ref[...] = qkv.astype(jnp.bfloat16).reshape(batch_block, seq_len, 3 * dim)

    # ---- Multi-head attention (heads statically unrolled, batched over Bb) ----
    # TODO(synk): for very long sequences switch to a KV-chunked online-softmax
    # (flash-style) inner loop so the (Bb, S, S) scores never fully materialize.
    for h in range(num_heads):
        q_lo = h * head_dim
        k_lo = dim + h * head_dim
        v_lo = 2 * dim + h * head_dim
        qh = qkv_ref[:, :, q_lo:q_lo + head_dim]        # bf16 (Bb, S, hd), pre-scaled
        kh = qkv_ref[:, :, k_lo:k_lo + head_dim]        # bf16 (Bb, S, hd)
        vh = qkv_ref[:, :, v_lo:v_lo + head_dim]        # bf16 (Bb, S, hd)

        # Scores: contract last dims directly -> no materialized K transpose.
        s = jnp.einsum("bqd,bkd->bqk", qh, kh,
                       preferred_element_type=jnp.float32)                   # f32 (Bb, S, S)
        s = s - jnp.max(s, axis=-1, keepdims=True)
        p = jnp.exp(s)                                   # f32 exp (v5e-safe accuracy)
        p = p * pl.reciprocal(jnp.sum(p, axis=-1, keepdims=True), approx=True)
        ctx = jnp.einsum("bqk,bkd->bqd", p.astype(jnp.bfloat16), vh,
                         preferred_element_type=jnp.float32)                 # f32 (Bb, S, hd)

        # Drop each head's context at its static column offset; the output projection
        # then runs as ONE full-K (rows, D) @ (D, D) matmul instead of H shallow
        # K=head_dim matmuls.
        ctx_ref[:, q_lo:q_lo + head_dim] = ctx.reshape(rows, head_dim)

    out = jnp.dot(ctx_ref[...].astype(jnp.bfloat16), wo_ref[...],
                  preferred_element_type=jnp.float32) + bo_ref[...]
    o_ref[...] = out.reshape(batch_block, seq_len, dim).astype(o_ref.dtype)


def _vmem_capacity_bytes():
    """Generation-aware VMEM capacity; conservative 64 MiB (v7x per-core) fallback."""
    try:
        return int(pltpu.get_tpu_info().vmem_capacity_bytes)
    except Exception:
        return 64 * _MIB


def _working_set_bytes(batch_block, seq, dim, single_buffer_weights):
    """Rough per-grid-step VMEM footprint estimate for the block picker / vmem limit."""
    rows = batch_block * seq
    wbuf = 1 if single_buffer_weights else 2
    weights = wbuf * (2 * (3 * dim * dim) + 2 * dim * dim          # bf16 W_qkv + Wo
                      + 4 * (3 * dim) + 4 * (4 * dim))             # f32 biases + LN params
    io = 2 * 2 * rows * dim * 4                                    # x + out blocks, dbl-buffered
    qkv = rows * 3 * dim * 2                                       # bf16 qkv scratch
    ctx = rows * dim * 4                                           # f32 ctx scratch
    scores = 2 * batch_block * seq * seq * 4                       # s + p (live per head, f32)
    temps = 4 * rows * dim * 4                                     # LN / matmul temporaries
    return weights + io + qkv + ctx + scores + temps


def _pick_batch_block(batch, seq, dim, budget, single_buffer_weights):
    """Largest divisor of `batch` whose working set fits `budget`; prefer >=2 grid steps
    (an even split keeps both v7x TensorCores busy on the "parallel" batch axis)."""
    divisors = [d for d in range(1, batch + 1) if batch % d == 0]
    fitting = [d for d in divisors
               if _working_set_bytes(d, seq, dim, single_buffer_weights) <= budget]
    if not fitting:
        return 1
    best = max(fitting)
    if batch // best == 1 and batch > 1:
        multi_step = [d for d in fitting if batch // d >= 2]
        if multi_step:
            best = max(multi_step)
    return best


def multi_head_attention(x, params, *, num_heads, batch_block=None,
                         single_buffer_weights=True):
    """x: (B, S, D) float32. params: dict of LN / linear parameters (see init_params)."""
    B, S, D = x.shape
    assert D % num_heads == 0, "dim must be divisible by num_heads"
    head_dim = D // num_heads
    scale = head_dim ** (-0.5)
    # NOTE: best lane utilisation needs D (and ideally head_dim) to be a multiple of 128;
    # smaller dims remain correct, just lane-masked.

    vmem_cap = _vmem_capacity_bytes()
    if batch_block is None:
        batch_block = _pick_batch_block(B, S, D, int(0.35 * vmem_cap),
                                        single_buffer_weights)
    assert B % batch_block == 0
    grid_b = B // batch_block

    # Fuse Q/K/V weights, fold the softmax scale into the Q columns, pre-cast matmul
    # weights to bf16 (MXU-native on v5e/v6e/v7x). Biases / LN params stay f32.
    w_qkv = jnp.concatenate(
        [params["wq"] * scale, params["wk"], params["wv"]], axis=1).astype(jnp.bfloat16)
    b_qkv = jnp.concatenate(
        [params["bq"] * scale, params["bk"], params["bv"]], axis=1)          # (1, 3D) f32
    wo = params["wo"].astype(jnp.bfloat16)

    kernel = functools.partial(
        _mha_kernel, num_heads=num_heads, head_dim=head_dim,
        eps=1e-5, batch_block=batch_block, seq_len=S)

    # Grid-invariant parameter blocks never change across grid steps: single-buffer them
    # so default double-buffering does not waste VMEM (most binding on v7x's 64 MiB).
    w_mode = pl.Buffered(1) if single_buffer_weights else None

    def w_spec(shape):
        return pl.BlockSpec(shape, lambda b, _s=len(shape): (0,) * _s,
                            pipeline_mode=w_mode)

    flops = B * S * (8 * D * D + 4 * S * D)
    transcendentals = B * num_heads * S * S
    bytes_accessed = 8 * B * S * D + grid_b * (8 * D * D + 40 * D)

    vmem_limit = int(min(
        max(32 * _MIB,
            2 * _working_set_bytes(batch_block, S, D, single_buffer_weights)),
        0.85 * vmem_cap))

    return pl.pallas_call(
        kernel,
        out_shape=jax.ShapeDtypeStruct((B, S, D), jnp.float32),
        grid_spec=pltpu.PrefetchScalarGridSpec(
            num_scalar_prefetch=0,
            grid=(grid_b,),
            in_specs=[
                pl.BlockSpec((batch_block, S, D), lambda b: (b, 0, 0)),   # x
                w_spec((1, D)),                                            # ln gamma (f32)
                w_spec((1, D)),                                            # ln beta  (f32)
                w_spec((D, 3 * D)),                                        # fused W_qkv (bf16)
                w_spec((1, 3 * D)),                                        # fused b_qkv (f32)
                w_spec((D, D)),                                            # Wo (bf16)
                w_spec((1, D)),                                            # bo (f32)
            ],
            out_specs=pl.BlockSpec((batch_block, S, D), lambda b: (b, 0, 0)),
            scratch_shapes=[
                pltpu.VMEM((batch_block, S, 3 * D), jnp.bfloat16),   # qkv slab
                pltpu.VMEM((batch_block * S, D), jnp.float32),       # ctx accumulator
            ],
        ),
        compiler_params=pltpu.CompilerParams(
            dimension_semantics=("parallel",),
            vmem_limit_bytes=vmem_limit),
        cost_estimate=pl.CostEstimate(
            flops=int(flops),
            transcendentals=int(transcendentals),
            bytes_accessed=int(bytes_accessed)),
    )(x, params["gamma"], params["beta"], w_qkv, b_qkv, wo, params["bo"])


def init_params(key, dim):
    """Deterministic synthetic parameters. Weights stored as (in, out)."""
    ks = jax.random.split(key, 8)
    s = 1.0 / jnp.sqrt(dim)
    return {
        "gamma": jnp.ones((1, dim), jnp.float32),
        "beta": jnp.zeros((1, dim), jnp.float32),
        "wq": jax.random.uniform(ks[0], (dim, dim), jnp.float32, -s, s),
        "bq": jax.random.uniform(ks[1], (1, dim), jnp.float32, -s, s),
        "wk": jax.random.uniform(ks[2], (dim, dim), jnp.float32, -s, s),
        "bk": jax.random.uniform(ks[3], (1, dim), jnp.float32, -s, s),
        "wv": jax.random.uniform(ks[4], (dim, dim), jnp.float32, -s, s),
        "bv": jax.random.uniform(ks[5], (1, dim), jnp.float32, -s, s),
        "wo": jax.random.uniform(ks[6], (dim, dim), jnp.float32, -s, s),
        "bo": jax.random.uniform(ks[7], (1, dim), jnp.float32, -s, s),
    }


def _reference(x, params, *, num_heads):
    """Pure-JAX f32 reference mirroring the PyTorch forward."""
    B, S, D = x.shape
    hd = D // num_heads
    mean = jnp.mean(x, axis=-1, keepdims=True)
    var = jnp.mean((x - mean) ** 2, axis=-1, keepdims=True)
    xn = (x - mean) / jnp.sqrt(var + 1e-5) * params["gamma"] + params["beta"]
    q = xn @ params["wq"] + params["bq"]
    k = xn @ params["wk"] + params["bk"]
    v = xn @ params["wv"] + params["bv"]
    def split(t):
        return t.reshape(B, S, num_heads, hd).transpose(0, 2, 1, 3)
    q, k, v = split(q), split(k), split(v)
    attn = jax.nn.softmax(jnp.einsum("bhqd,bhkd->bhqk", q, k) * hd ** -0.5, axis=-1)
    out = jnp.einsum("bhqk,bhkd->bhqd", attn, v)
    out = out.transpose(0, 2, 1, 3).reshape(B, S, D)
    return out @ params["wo"] + params["bo"]


if __name__ == "__main__":
    key = jax.random.PRNGKey(0)
    kx, kp = jax.random.split(key)

    B, S, D = 2, 8, 32
    NUM_HEADS = 4

    x = jax.random.normal(kx, (B, S, D), jnp.float32)
    params = init_params(kp, D)

    try:
        out = multi_head_attention(x, params, num_heads=NUM_HEADS)
    except Exception:
        # Fallback if this runtime rejects single-buffered (pl.Buffered(1)) param blocks.
        out = multi_head_attention(x, params, num_heads=NUM_HEADS,
                                   single_buffer_weights=False)
    out = jax.block_until_ready(out)

    ref = _reference(x, params, num_heads=NUM_HEADS)
    assert out.shape == (B, S, D)
    # bf16 MXU matmuls + approx softmax reciprocal -> bf16-level tolerance vs f32 reference.
    assert jnp.allclose(out, ref, atol=2e-2, rtol=2e-2), "mismatch vs reference"

    print("KERNEL_OK")
</pallas_src>

<mosaic_0001>
module attributes {stable_mosaic.version = 11 : i64} {
  func.func @_mha_kernel(%arg0: i32, %arg1: memref<1x8x32xf32, #tpu.memory_space<vmem>>, %arg2: memref<1x32xf32, #tpu.memory_space<vmem>>, %arg3: memref<1x32xf32, #tpu.memory_space<vmem>>, %arg4: memref<32x96xbf16, #tpu.memory_space<vmem>>, %arg5: memref<1x96xf32, #tpu.memory_space<vmem>>, %arg6: memref<32x32xbf16, #tpu.memory_space<vmem>>, %arg7: memref<1x32xf32, #tpu.memory_space<vmem>>, %arg8: memref<1x8x32xf32, #tpu.memory_space<vmem>>, %arg9: memref<1x8x96xbf16, #tpu.memory_space<vmem>>, %arg10: memref<8x32xf32, #tpu.memory_space<vmem>>) attributes {dimension_semantics = [#tpu.dimension_semantics<parallel>], iteration_bounds = array<i64: 2>, scalar_prefetch = 0 : i64, scratch_operands = 2 : i64, tpu.core_type = #tpu.core_type<tc>, window_params = [{transform_indices = @transform_0, window_bounds = array<i64: 1, 8, 32>}, {pipeline_mode = #tpu.pipeline_mode<synchronous>, transform_indices = @transform_1, window_bounds = array<i64: 1, 32>}, {pipeline_mode = #tpu.pipeline_mode<synchronous>, transform_indices = @transform_2, window_bounds = array<i64: 1, 32>}, {pipeline_mode = #tpu.pipeline_mode<synchronous>, transform_indices = @transform_3, window_bounds = array<i64: 32, 96>}, {pipeline_mode = #tpu.pipeline_mode<synchronous>, transform_indices = @transform_4, window_bounds = array<i64: 1, 96>}, {pipeline_mode = #tpu.pipeline_mode<synchronous>, transform_indices = @transform_5, window_bounds = array<i64: 32, 32>}, {pipeline_mode = #tpu.pipeline_mode<synchronous>, transform_indices = @transform_6, window_bounds = array<i64: 1, 32>}, {transform_indices = @transform_7, window_bounds = array<i64: 1, 8, 32>}]} {
    %c0 = arith.constant 0 : index
    %c0_0 = arith.constant 0 : index
    %c0_1 = arith.constant 0 : index
    %0 = vector.load %arg1[%c0, %c0_0, %c0_1] : memref<1x8x32xf32, #tpu.memory_space<vmem>>, vector<1x8x32xf32>
    %1 = vector.shape_cast %0 : vector<1x8x32xf32> to vector<8x32xf32>
    %cst = arith.constant dense<0.000000e+00> : vector<8xf32>
    %2 = vector.multi_reduction <add>, %1, %cst [1] : vector<8x32xf32> to vector<8xf32>
    %3 = vector.shape_cast %2 : vector<8xf32> to vector<8x1xf32>
    %cst_2 = arith.constant 3.200000e+01 : f32
    %4 = vector.broadcast %cst_2 : f32 to vector<8x1xf32>
    %5 = arith.divf %3, %4 : vector<8x1xf32>
    %6 = vector.broadcast %5 : vector<8x1xf32> to vector<8x32xf32>
    %7 = arith.subf %1, %6 : vector<8x32xf32>
    %8 = arith.mulf %7, %7 : vector<8x32xf32>
    %cst_3 = arith.constant dense<0.000000e+00> : vector<8xf32>
    %9 = vector.multi_reduction <add>, %8, %cst_3 [1] : vector<8x32xf32> to vector<8xf32>
    %10 = vector.shape_cast %9 : vector<8xf32> to vector<8x1xf32>
    %cst_4 = arith.constant 3.200000e+01 : f32
    %11 = vector.broadcast %cst_4 : f32 to vector<8x1xf32>
    %12 = arith.divf %10, %11 : vector<8x1xf32>
    %13 = vector.broadcast %5 : vector<8x1xf32> to vector<8x32xf32>
    %14 = arith.subf %1, %13 : vector<8x32xf32>
    %cst_5 = arith.constant 9.99999974E-6 : f32
    %15 = vector.broadcast %cst_5 : f32 to vector<8x1xf32>
    %16 = arith.addf %12, %15 : vector<8x1xf32>
    %17 = math.rsqrt %16 : vector<8x1xf32>
    %18 = vector.broadcast %17 : vector<8x1xf32> to vector<8x32xf32>
    %19 = arith.mulf %14, %18 : vector<8x32xf32>
    %c0_6 = arith.constant 0 : index
    %c0_7 = arith.constant 0 : index
    %20 = vector.load %arg2[%c0_6, %c0_7] : memref<1x32xf32, #tpu.memory_space<vmem>>, vector<1x32xf32>
    %21 = vector.broadcast %20 : vector<1x32xf32> to vector<8x32xf32>
    %22 = arith.mulf %19, %21 : vector<8x32xf32>
    %c0_8 = arith.constant 0 : index
    %c0_9 = arith.constant 0 : index
    %23 = vector.load %arg3[%c0_8, %c0_9] : memref<1x32xf32, #tpu.memory_space<vmem>>, vector<1x32xf32>
    %24 = vector.broadcast %23 : vector<1x32xf32> to vector<8x32xf32>
    %25 = arith.addf %22, %24 : vector<8x32xf32>
    %26 = arith.truncf %25 : vector<8x32xf32> to vector<8x32xbf16>
    %c0_10 = arith.constant 0 : index
    %c0_11 = arith.constant 0 : index
    %27 = vector.load %arg4[%c0_10, %c0_11] : memref<32x96xbf16, #tpu.memory_space<vmem>>, vector<32x96xbf16>
    %cst_12 = arith.constant dense<0.000000e+00> : vector<8x96xf32>
    %28 = tpu.matmul %26, %27, %cst_12 {dimension_numbers = #tpu.dot_dimension_numbers<[1], [0], [0], [1], [0, 0, 1, 1], [], []>} : vector<8x32xbf16>, vector<32x96xbf16>, vector<8x96xf32> -> vector<8x96xf32>
    %c0_13 = arith.constant 0 : index
    %c0_14 = arith.constant 0 : index
    %29 = vector.load %arg5[%c0_13, %c0_14] : memref<1x96xf32, #tpu.memory_space<vmem>>, vector<1x96xf32>
    %30 = vector.broadcast %29 : vector<1x96xf32> to vector<8x96xf32>
    %31 = arith.addf %28, %30 : vector<8x96xf32>
    %32 = arith.truncf %31 : vector<8x96xf32> to vector<8x96xbf16>
    %33 = vector.shape_cast %32 : vector<8x96xbf16> to vector<1x8x96xbf16>
    %c0_15 = arith.constant 0 : index
    %c0_16 = arith.constant 0 : index
    %c0_17 = arith.constant 0 : index
    %34 = vector.load %arg9[%c0_15, %c0_16, %c0_17] : memref<1x8x96xbf16, #tpu.memory_space<vmem>>, vector<1x8x96xbf16>
    tpu.vector_store %arg9[%c0_15, %c0_16, %c0_17], %33 {strides = array<i32>} : memref<1x8x96xbf16, #tpu.memory_space<vmem>>, vector<1x8x96xbf16>,
    %c0_18 = arith.constant 0 : index
    %c0_19 = arith.constant 0 : index
    %c0_20 = arith.constant 0 : index
    %35 = vector.load %arg9[%c0_18, %c0_19, %c0_20] : memref<1x8x96xbf16, #tpu.memory_space<vmem>>, vector<1x8x8xbf16>
    %c0_21 = arith.constant 0 : index
    %c0_22 = arith.constant 0 : index
    %c32 = arith.constant 32 : index
    %36 = vector.load %arg9[%c0_21, %c0_22, %c32] : memref<1x8x96xbf16, #tpu.memory_space<vmem>>, vector<1x8x8xbf16>
    %c0_23 = arith.constant 0 : index
    %c0_24 = arith.constant 0 : index
    %c64 = arith.constant 64 : index
    %37 = vector.load %arg9[%c0_23, %c0_24, %c64] : memref<1x8x96xbf16, #tpu.memory_space<vmem>>, vector<1x8x8xbf16>
    "tpu.trace_start"() <{level = 10 : i32, message = "bqd,bkd->bqk"}> : () -> ()
    %cst_25 = arith.constant dense<0.000000e+00> : vector<1x8x8xf32>
    %38 = tpu.matmul %35, %36, %cst_25 {dimension_numbers = #tpu.dot_dimension_numbers<[2], [2], [1], [1], [0, 0, 0, 1, 1, 1], [0], [0]>} : vector<1x8x8xbf16>, vector<1x8x8xbf16>, vector<1x8x8xf32> -> vector<1x8x8xf32>
    "tpu.trace_stop"() : () -> ()
    %cst_26 = arith.constant dense<0xFF800000> : vector<1x8xf32>
    %39 = vector.multi_reduction <maximumf>, %38, %cst_26 [2] : vector<1x8x8xf32> to vector<1x8xf32>
    %40 = vector.shape_cast %39 : vector<1x8xf32> to vector<1x8x1xf32>
    %41 = vector.broadcast %40 : vector<1x8x1xf32> to vector<1x8x8xf32>
    %42 = arith.subf %38, %41 : vector<1x8x8xf32>
    %43 = math.exp %42 : vector<1x8x8xf32>
    %cst_27 = arith.constant dense<0.000000e+00> : vector<1x8xf32>
    %44 = vector.multi_reduction <add>, %43, %cst_27 [2] : vector<1x8x8xf32> to vector<1x8xf32>
    %45 = vector.shape_cast %44 : vector<1x8xf32> to vector<1x8x1xf32>
    %46 = tpu.reciprocal %45 {approx = true} : vector<1x8x1xf32> -> vector<1x8x1xf32>
    %47 = vector.broadcast %46 : vector<1x8x1xf32> to vector<1x8x8xf32>
    %48 = arith.mulf %43, %47 : vector<1x8x8xf32>
    %49 = arith.truncf %48 : vector<1x8x8xf32> to vector<1x8x8xbf16>
    "tpu.trace_start"() <{level = 10 : i32, message = "bqk,bkd->bqd"}> : () -> ()
    %cst_28 = arith.constant dense<0.000000e+00> : vector<1x8x8xf32>
    %50 = tpu.matmul %49, %37, %cst_28 {dimension_numbers = #tpu.dot_dimension_numbers<[2], [1], [1], [2], [0, 0, 0, 1, 1, 2], [0], [0]>} : vector<1x8x8xbf16>, vector<1x8x8xbf16>, vector<1x8x8xf32> -> vector<1x8x8xf32>
    "tpu.trace_stop"() : () -> ()
    %51 = vector.shape_cast %50 : vector<1x8x8xf32> to vector<8x8xf32>
    %c0_29 = arith.constant 0 : index
    %c0_30 = arith.constant 0 : index
    %52 = vector.load %arg10[%c0_29, %c0_30] : memref<8x32xf32, #tpu.memory_space<vmem>>, vector<8x8xf32>
    tpu.vector_store %arg10[%c0_29, %c0_30], %51 {strides = array<i32>} : memref<8x32xf32, #tpu.memory_space<vmem>>, vector<8x8xf32>,
    %c0_31 = arith.constant 0 : index
    %c0_32 = arith.constant 0 : index
    %c8 = arith.constant 8 : index
    %53 = vector.load %arg9[%c0_31, %c0_32, %c8] : memref<1x8x96xbf16, #tpu.memory_space<vmem>>, vector<1x8x8xbf16>
    %c0_33 = arith.constant 0 : index
    %c0_34 = arith.constant 0 : index
    %c40 = arith.constant 40 : index
    %54 = vector.load %arg9[%c0_33, %c0_34, %c40] : memref<1x8x96xbf16, #tpu.memory_space<vmem>>, vector<1x8x8xbf16>
    %c0_35 = arith.constant 0 : index
    %c0_36 = arith.constant 0 : index
    %c72 = arith.constant 72 : index
    %55 = vector.load %arg9[%c0_35, %c0_36, %c72] : memref<1x8x96xbf16, #tpu.memory_space<vmem>>, vector<1x8x8xbf16>
    "tpu.trace_start"() <{level = 10 : i32, message = "bqd,bkd->bqk"}> : () -> ()
    %cst_37 = arith.constant dense<0.000000e+00> : vector<1x8x8xf32>
    %56 = tpu.matmul %53, %54, %cst_37 {dimension_numbers = #tpu.dot_dimension_numbers<[2], [2], [1], [1], [0, 0, 0, 1, 1, 1], [0], [0]>} : vector<1x8x8xbf16>, vector<1x8x8xbf16>, vector<1x8x8xf32> -> vector<1x8x8xf32>
    "tpu.trace_stop"() : () -> ()
    %cst_38 = arith.constant dense<0xFF800000> : vector<1x8xf32>
    %57 = vector.multi_reduction <maximumf>, %56, %cst_38 [2] : vector<1x8x8xf32> to vector<1x8xf32>
    %58 = vector.shape_cast %57 : vector<1x8xf32> to vector<1x8x1xf32>
    %59 = vector.broadcast %58 : vector<1x8x1xf32> to vector<1x8x8xf32>
    %60 = arith.subf %56, %59 : vector<1x8x8xf32>
    %61 = math.exp %60 : vector<1x8x8xf32>
    %cst_39 = arith.constant dense<0.000000e+00> : vector<1x8xf32>
    %62 = vector.multi_reduction <add>, %61, %cst_39 [2] : vector<1x8x8xf32> to vector<1x8xf32>
    %63 = vector.shape_cast %62 : vector<1x8xf32> to vector<1x8x1xf32>
    %64 = tpu.reciprocal %63 {approx = true} : vector<1x8x1xf32> -> vector<1x8x1xf32>
    %65 = vector.broadcast %64 : vector<1x8x1xf32> to vector<1x8x8xf32>
    %66 = arith.mulf %61, %65 : vector<1x8x8xf32>
    %67 = arith.truncf %66 : vector<1x8x8xf32> to vector<1x8x8xbf16>
    "tpu.trace_start"() <{level = 10 : i32, message = "bqk,bkd->bqd"}> : () -> ()
    %cst_40 = arith.constant dense<0.000000e+00> : vector<1x8x8xf32>
    %68 = tpu.matmul %67, %55, %cst_40 {dimension_numbers = #tpu.dot_dimension_numbers<[2], [1], [1], [2], [0, 0, 0, 1, 1, 2], [0], [0]>} : vector<1x8x8xbf16>, vector<1x8x8xbf16>, vector<1x8x8xf32> -> vector<1x8x8xf32>
    "tpu.trace_stop"() : () -> ()
    %69 = vector.shape_cast %68 : vector<1x8x8xf32> to vector<8x8xf32>
    %c0_41 = arith.constant 0 : index
    %c8_42 = arith.constant 8 : index
    %70 = vector.load %arg10[%c0_41, %c8_42] : memref<8x32xf32, #tpu.memory_space<vmem>>, vector<8x8xf32>
    tpu.vector_store %arg10[%c0_41, %c8_42], %69 {strides = array<i32>} : memref<8x32xf32, #tpu.memory_space<vmem>>, vector<8x8xf32>,
    %c0_43 = arith.constant 0 : index
    %c0_44 = arith.constant 0 : index
    %c16 = arith.constant 16 : index
    %71 = vector.load %arg9[%c0_43, %c0_44, %c16] : memref<1x8x96xbf16, #tpu.memory_space<vmem>>, vector<1x8x8xbf16>
    %c0_45 = arith.constant 0 : index
    %c0_46 = arith.constant 0 : index
    %c48 = arith.constant 48 : index
    %72 = vector.load %arg9[%c0_45, %c0_46, %c48] : memref<1x8x96xbf16, #tpu.memory_space<vmem>>, vector<1x8x8xbf16>
    %c0_47 = arith.constant 0 : index
    %c0_48 = arith.constant 0 : index
    %c80 = arith.constant 80 : index
    %73 = vector.load %arg9[%c0_47, %c0_48, %c80] : memref<1x8x96xbf16, #tpu.memory_space<vmem>>, vector<1x8x8xbf16>
    "tpu.trace_start"() <{level = 10 : i32, message = "bqd,bkd->bqk"}> : () -> ()
    %cst_49 = arith.constant dense<0.000000e+00> : vector<1x8x8xf32>
    %74 = tpu.matmul %71, %72, %cst_49 {dimension_numbers = #tpu.dot_dimension_numbers<[2], [2], [1], [1], [0, 0, 0, 1, 1, 1], [0], [0]>} : vector<1x8x8xbf16>, vector<1x8x8xbf16>, vector<1x8x8xf32> -> vector<1x8x8xf32>
    "tpu.trace_stop"() : () -> ()
    %cst_50 = arith.constant dense<0xFF800000> : vector<1x8xf32>
    %75 = vector.multi_reduction <maximumf>, %74, %cst_50 [2] : vector<1x8x8xf32> to vector<1x8xf32>
    %76 = vector.shape_cast %75 : vector<1x8xf32> to vector<1x8x1xf32>
    %77 = vector.broadcast %76 : vector<1x8x1xf32> to vector<1x8x8xf32>
    %78 = arith.subf %74, %77 : vector<1x8x8xf32>
    %79 = math.exp %78 : vector<1x8x8xf32>
    %cst_51 = arith.constant dense<0.000000e+00> : vector<1x8xf32>
    %80 = vector.multi_reduction <add>, %79, %cst_51 [2] : vector<1x8x8xf32> to vector<1x8xf32>
    %81 = vector.shape_cast %80 : vector<1x8xf32> to vector<1x8x1xf32>
    %82 = tpu.reciprocal %81 {approx = true} : vector<1x8x1xf32> -> vector<1x8x1xf32>
    %83 = vector.broadcast %82 : vector<1x8x1xf32> to vector<1x8x8xf32>
    %84 = arith.mulf %79, %83 : vector<1x8x8xf32>
    %85 = arith.truncf %84 : vector<1x8x8xf32> to vector<1x8x8xbf16>
    "tpu.trace_start"() <{level = 10 : i32, message = "bqk,bkd->bqd"}> : () -> ()
    %cst_52 = arith.constant dense<0.000000e+00> : vector<1x8x8xf32>
    %86 = tpu.matmul %85, %73, %cst_52 {dimension_numbers = #tpu.dot_dimension_numbers<[2], [1], [1], [2], [0, 0, 0, 1, 1, 2], [0], [0]>} : vector<1x8x8xbf16>, vector<1x8x8xbf16>, vector<1x8x8xf32> -> vector<1x8x8xf32>
    "tpu.trace_stop"() : () -> ()
    %87 = vector.shape_cast %86 : vector<1x8x8xf32> to vector<8x8xf32>
    %c0_53 = arith.constant 0 : index
    %c16_54 = arith.constant 16 : index
    %88 = vector.load %arg10[%c0_53, %c16_54] : memref<8x32xf32, #tpu.memory_space<vmem>>, vector<8x8xf32>
    tpu.vector_store %arg10[%c0_53, %c16_54], %87 {strides = array<i32>} : memref<8x32xf32, #tpu.memory_space<vmem>>, vector<8x8xf32>,
    %c0_55 = arith.constant 0 : index
    %c0_56 = arith.constant 0 : index
    %c24 = arith.constant 24 : index
    %89 = vector.load %arg9[%c0_55, %c0_56, %c24] : memref<1x8x96xbf16, #tpu.memory_space<vmem>>, vector<1x8x8xbf16>
    %c0_57 = arith.constant 0 : index
    %c0_58 = arith.constant 0 : index
    %c56 = arith.constant 56 : index
    %90 = vector.load %arg9[%c0_57, %c0_58, %c56] : memref<1x8x96xbf16, #tpu.memory_space<vmem>>, vector<1x8x8xbf16>
    %c0_59 = arith.constant 0 : index
    %c0_60 = arith.constant 0 : index
    %c88 = arith.constant 88 : index
    %91 = vector.load %arg9[%c0_59, %c0_60, %c88] : memref<1x8x96xbf16, #tpu.memory_space<vmem>>, vector<1x8x8xbf16>
    "tpu.trace_start"() <{level = 10 : i32, message = "bqd,bkd->bqk"}> : () -> ()
    %cst_61 = arith.constant dense<0.000000e+00> : vector<1x8x8xf32>
    %92 = tpu.matmul %89, %90, %cst_61 {dimension_numbers = #tpu.dot_dimension_numbers<[2], [2], [1], [1], [0, 0, 0, 1, 1, 1], [0], [0]>} : vector<1x8x8xbf16>, vector<1x8x8xbf16>, vector<1x8x8xf32> -> vector<1x8x8xf32>
    "tpu.trace_stop"() : () -> ()
    %cst_62 = arith.constant dense<0xFF800000> : vector<1x8xf32>
    %93 = vector.multi_reduction <maximumf>, %92, %cst_62 [2] : vector<1x8x8xf32> to vector<1x8xf32>
    %94 = vector.shape_cast %93 : vector<1x8xf32> to vector<1x8x1xf32>
    %95 = vector.broadcast %94 : vector<1x8x1xf32> to vector<1x8x8xf32>
    %96 = arith.subf %92, %95 : vector<1x8x8xf32>
    %97 = math.exp %96 : vector<1x8x8xf32>
    %cst_63 = arith.constant dense<0.000000e+00> : vector<1x8xf32>
    %98 = vector.multi_reduction <add>, %97, %cst_63 [2] : vector<1x8x8xf32> to vector<1x8xf32>
    %99 = vector.shape_cast %98 : vector<1x8xf32> to vector<1x8x1xf32>
    %100 = tpu.reciprocal %99 {approx = true} : vector<1x8x1xf32> -> vector<1x8x1xf32>
    %101 = vector.broadcast %100 : vector<1x8x1xf32> to vector<1x8x8xf32>
    %102 = arith.mulf %97, %101 : vector<1x8x8xf32>
    %103 = arith.truncf %102 : vector<1x8x8xf32> to vector<1x8x8xbf16>
    "tpu.trace_start"() <{level = 10 : i32, message = "bqk,bkd->bqd"}> : () -> ()
    %cst_64 = arith.constant dense<0.000000e+00> : vector<1x8x8xf32>
    %104 = tpu.matmul %103, %91, %cst_64 {dimension_numbers = #tpu.dot_dimension_numbers<[2], [1], [1], [2], [0, 0, 0, 1, 1, 2], [0], [0]>} : vector<1x8x8xbf16>, vector<1x8x8xbf16>, vector<1x8x8xf32> -> vector<1x8x8xf32>
    "tpu.trace_stop"() : () -> ()
    %105 = vector.shape_cast %104 : vector<1x8x8xf32> to vector<8x8xf32>
    %c0_65 = arith.constant 0 : index
    %c24_66 = arith.constant 24 : index
    %106 = vector.load %arg10[%c0_65, %c24_66] : memref<8x32xf32, #tpu.memory_space<vmem>>, vector<8x8xf32>
    tpu.vector_store %arg10[%c0_65, %c24_66], %105 {strides = array<i32>} : memref<8x32xf32, #tpu.memory_space<vmem>>, vector<8x8xf32>,
    %c0_67 = arith.constant 0 : index
    %c0_68 = arith.constant 0 : index
    %107 = vector.load %arg10[%c0_67, %c0_68] : memref<8x32xf32, #tpu.memory_space<vmem>>, vector<8x32xf32>
    %108 = arith.truncf %107 : vector<8x32xf32> to vector<8x32xbf16>
    %c0_69 = arith.constant 0 : index
    %c0_70 = arith.constant 0 : index
    %109 = vector.load %arg6[%c0_69, %c0_70] : memref<32x32xbf16, #tpu.memory_space<vmem>>, vector<32x32xbf16>
    %cst_71 = arith.constant dense<0.000000e+00> : vector<8x32xf32>
    %110 = tpu.matmul %108, %109, %cst_71 {dimension_numbers = #tpu.dot_dimension_numbers<[1], [0], [0], [1], [0, 0, 1, 1], [], []>} : vector<8x32xbf16>, vector<32x32xbf16>, vector<8x32xf32> -> vector<8x32xf32>
    %c0_72 = arith.constant 0 : index
    %c0_73 = arith.constant 0 : index
    %111 = vector.load %arg7[%c0_72, %c0_73] : memref<1x32xf32, #tpu.memory_space<vmem>>, vector<1x32xf32>
    %112 = vector.broadcast %111 : vector<1x32xf32> to vector<8x32xf32>
    %113 = arith.addf %110, %112 : vector<8x32xf32>
    %114 = vector.shape_cast %113 : vector<8x32xf32> to vector<1x8x32xf32>
    %c0_74 = arith.constant 0 : index
    %c0_75 = arith.constant 0 : index
    %c0_76 = arith.constant 0 : index
    %115 = vector.load %arg8[%c0_74, %c0_75, %c0_76] : memref<1x8x32xf32, #tpu.memory_space<vmem>>, vector<1x8x32xf32>
    tpu.vector_store %arg8[%c0_74, %c0_75, %c0_76], %114 {strides = array<i32>} : memref<1x8x32xf32, #tpu.memory_space<vmem>>, vector<1x8x32xf32>,
    return
  }
  func.func @transform_0(%arg0: i32) -> (i32, i32, i32) {
    %c0_i32 = arith.constant 0 : i32
    %c0_i32_0 = arith.constant 0 : i32
    %c0_i32_1 = arith.constant 0 : i32
    return %arg0, %c0_i32, %c0_i32_0 : i32, i32, i32
  }
  func.func @transform_1(%arg0: i32) -> (i32, i32) {
    %c0_i32 = arith.constant 0 : i32
    %c0_i32_0 = arith.constant 0 : i32
    %c0_i32_1 = arith.constant 0 : i32
    return %c0_i32, %c0_i32_0 : i32, i32
  }
  func.func @transform_2(%arg0: i32) -> (i32, i32) {
    %c0_i32 = arith.constant 0 : i32
    %c0_i32_0 = arith.constant 0 : i32
    %c0_i32_1 = arith.constant 0 : i32
    return %c0_i32, %c0_i32_0 : i32, i32
  }
  func.func @transform_3(%arg0: i32) -> (i32, i32) {
    %c0_i32 = arith.constant 0 : i32
    %c0_i32_0 = arith.constant 0 : i32
    %c0_i32_1 = arith.constant 0 : i32
    return %c0_i32, %c0_i32_0 : i32, i32
  }
  func.func @transform_4(%arg0: i32) -> (i32, i32) {
    %c0_i32 = arith.constant 0 : i32
    %c0_i32_0 = arith.constant 0 : i32
    %c0_i32_1 = arith.constant 0 : i32
    return %c0_i32, %c0_i32_0 : i32, i32
  }
  func.func @transform_5(%arg0: i32) -> (i32, i32) {
    %c0_i32 = arith.constant 0 : i32
    %c0_i32_0 = arith.constant 0 : i32
    %c0_i32_1 = arith.constant 0 : i32
    return %c0_i32, %c0_i32_0 : i32, i32
  }
  func.func @transform_6(%arg0: i32) -> (i32, i32) {
    %c0_i32 = arith.constant 0 : i32
    %c0_i32_0 = arith.constant 0 : i32
    %c0_i32_1 = arith.constant 0 : i32
    return %c0_i32, %c0_i32_0 : i32, i32
  }
  func.func @transform_7(%arg0: i32) -> (i32, i32, i32) {
    %c0_i32 = arith.constant 0 : i32
    %c0_i32_0 = arith.constant 0 : i32
    %c0_i32_1 = arith.constant 0 : i32
    return %arg0, %c0_i32, %c0_i32_0 : i32, i32, i32
  }
}

module attributes {stable_mosaic.version = 11 : i64} {
  func.func @_mha_kernel(%arg0: i32, %arg1: memref<1x8x32xf32, #tpu.memory_space<vmem>>, %arg2: memref<1x32xf32, #tpu.memory_space<vmem>>, %arg3: memref<1x32xf32, #tpu.memory_space<vmem>>, %arg4: memref<32x96xbf16, #tpu.memory_space<vmem>>, %arg5: memref<1x96xf32, #tpu.memory_space<vmem>>, %arg6: memref<32x32xbf16, #tpu.memory_space<vmem>>, %arg7: memref<1x32xf32, #tpu.memory_space<vmem>>, %arg8: memref<1x8x32xf32, #tpu.memory_space<vmem>>, %arg9: memref<1x8x96xbf16, #tpu.memory_space<vmem>>, %arg10: memref<8x32xf32, #tpu.memory_space<vmem>>) attributes {dimension_semantics = [#tpu.dimension_semantics<parallel>], iteration_bounds = array<i64: 2>, scalar_prefetch = 0 : i64, scratch_operands = 2 : i64, tpu.core_type = #tpu.core_type<tc>, window_params = [{transform_indices = @transform_0, window_bounds = array<i64: 1, 8, 32>}, {pipeline_mode = #tpu.pipeline_mode<synchronous>, transform_indices = @transform_1, window_bounds = array<i64: 1, 32>}, {pipeline_mode = #tpu.pipeline_mode<synchronous>, transform_indices = @transform_2, window_bounds = array<i64: 1, 32>}, {pipeline_mode = #tpu.pipeline_mode<synchronous>, transform_indices = @transform_3, window_bounds = array<i64: 32, 96>}, {pipeline_mode = #tpu.pipeline_mode<synchronous>, transform_indices = @transform_4, window_bounds = array<i64: 1, 96>}, {pipeline_mode = #tpu.pipeline_mode<synchronous>, transform_indices = @transform_5, window_bounds = array<i64: 32, 32>}, {pipeline_mode = #tpu.pipeline_mode<synchronous>, transform_indices = @transform_6, window_bounds = array<i64: 1, 32>}, {transform_indices = @transform_7, window_bounds = array<i64: 1, 8, 32>}]} {
    %c0 = arith.constant 0 : index
    %c0_0 = arith.constant 0 : index
    %c0_1 = arith.constant 0 : index
    %0 = vector.load %arg1[%c0, %c0_0, %c0_1] : memref<1x8x32xf32, #tpu.memory_space<vmem>>, vector<1x8x32xf32>
    %1 = vector.shape_cast %0 : vector<1x8x32xf32> to vector<8x32xf32>
    %cst = arith.constant dense<0.000000e+00> : vector<8xf32>
    %2 = vector.multi_reduction <add>, %1, %cst [1] : vector<8x32xf32> to vector<8xf32>
    %3 = vector.shape_cast %2 : vector<8xf32> to vector<8x1xf32>
    %cst_2 = arith.constant 3.200000e+01 : f32
    %4 = vector.broadcast %cst_2 : f32 to vector<8x1xf32>
    %5 = arith.divf %3, %4 : vector<8x1xf32>
    %6 = vector.broadcast %5 : vector<8x1xf32> to vector<8x32xf32>
    %7 = arith.subf %1, %6 : vector<8x32xf32>
    %8 = arith.mulf %7, %7 : vector<8x32xf32>
    %cst_3 = arith.constant dense<0.000000e+00> : vector<8xf32>
    %9 = vector.multi_reduction <add>, %8, %cst_3 [1] : vector<8x32xf32> to vector<8xf32>
    %10 = vector.shape_cast %9 : vector<8xf32> to vector<8x1xf32>
    %cst_4 = arith.constant 3.200000e+01 : f32
    %11 = vector.broadcast %cst_4 : f32 to vector<8x1xf32>
    %12 = arith.divf %10, %11 : vector<8x1xf32>
    %13 = vector.broadcast %5 : vector<8x1xf32> to vector<8x32xf32>
    %14 = arith.subf %1, %13 : vector<8x32xf32>
    %cst_5 = arith.constant 9.99999974E-6 : f32
    %15 = vector.broadcast %cst_5 : f32 to vector<8x1xf32>
    %16 = arith.addf %12, %15 : vector<8x1xf32>
    %17 = math.rsqrt %16 : vector<8x1xf32>
    %18 = vector.broadcast %17 : vector<8x1xf32> to vector<8x32xf32>
    %19 = arith.mulf %14, %18 : vector<8x32xf32>
    %c0_6 = arith.constant 0 : index
    %c0_7 = arith.constant 0 : index
    %20 = vector.load %arg2[%c0_6, %c0_7] : memref<1x32xf32, #tpu.memory_space<vmem>>, vector<1x32xf32>
    %21 = vector.broadcast %20 : vector<1x32xf32> to vector<8x32xf32>
    %22 = arith.mulf %19, %21 : vector<8x32xf32>
    %c0_8 = arith.constant 0 : index
    %c0_9 = arith.constant 0 : index
    %23 = vector.load %arg3[%c0_8, %c0_9] : memref<1x32xf32, #tpu.memory_space<vmem>>, vector<1x32xf32>
    %24 = vector.broadcast %23 : vector<1x32xf32> to vector<8x32xf32>
    %25 = arith.addf %22, %24 : vector<8x32xf32>
    %26 = arith.truncf %25 : vector<8x32xf32> to vector<8x32xbf16>
    %c0_10 = arith.constant 0 : index
    %c0_11 = arith.constant 0 : index
    %27 = vector.load %arg4[%c0_10, %c0_11] : memref<32x96xbf16, #tpu.memory_space<vmem>>, vector<32x96xbf16>
    %cst_12 = arith.constant dense<0.000000e+00> : vector<8x96xf32>
    %28 = tpu.matmul %26, %27, %cst_12 {dimension_numbers = #tpu.dot_dimension_numbers<[1], [0], [0], [1], [0, 0, 1, 1], [], []>} : vector<8x32xbf16>, vector<32x96xbf16>, vector<8x96xf32> -> vector<8x96xf32>
    %c0_13 = arith.constant 0 : index
    %c0_14 = arith.constant 0 : index
    %29 = vector.load %arg5[%c0_13, %c0_14] : memref<1x96xf32, #tpu.memory_space<vmem>>, vector<1x96xf32>
    %30 = vector.broadcast %29 : vector<1x96xf32> to vector<8x96xf32>
    %31 = arith.addf %28, %30 : vector<8x96xf32>
    %32 = arith.truncf %31 : vector<8x96xf32> to vector<8x96xbf16>
    %33 = vector.shape_cast %32 : vector<8x96xbf16> to vector<1x8x96xbf16>
    %c0_15 = arith.constant 0 : index
    %c0_16 = arith.constant 0 : index
    %c0_17 = arith.constant 0 : index
    %34 = vector.load %arg9[%c0_15, %c0_16, %c0_17] : memref<1x8x96xbf16, #tpu.memory_space<vmem>>, vector<1x8x96xbf16>
    tpu.vector_store %arg9[%c0_15, %c0_16, %c0_17], %33 {strides = array<i32>} : memref<1x8x96xbf16, #tpu.memory_space<vmem>>, vector<1x8x96xbf16>,
    %c0_18 = arith.constant 0 : index
    %c0_19 = arith.constant 0 : index
    %c0_20 = arith.constant 0 : index
    %35 = vector.load %arg9[%c0_18, %c0_19, %c0_20] : memref<1x8x96xbf16, #tpu.memory_space<vmem>>, vector<1x8x8xbf16>
    %c0_21 = arith.constant 0 : index
    %c0_22 = arith.constant 0 : index
    %c32 = arith.constant 32 : index
    %36 = vector.load %arg9[%c0_21, %c0_22, %c32] : memref<1x8x96xbf16, #tpu.memory_space<vmem>>, vector<1x8x8xbf16>
    %c0_23 = arith.constant 0 : index
    %c0_24 = arith.constant 0 : index
    %c64 = arith.constant 64 : index
    %37 = vector.load %arg9[%c0_23, %c0_24, %c64] : memref<1x8x96xbf16, #tpu.memory_space<vmem>>, vector<1x8x8xbf16>
    "tpu.trace_start"() <{level = 10 : i32, message = "bqd,bkd->bqk"}> : () -> ()
    %cst_25 = arith.constant dense<0.000000e+00> : vector<1x8x8xf32>
    %38 = tpu.matmul %35, %36, %cst_25 {dimension_numbers = #tpu.dot_dimension_numbers<[2], [2], [1], [1], [0, 0, 0, 1, 1, 1], [0], [0]>} : vector<1x8x8xbf16>, vector<1x8x8xbf16>, vector<1x8x8xf32> -> vector<1x8x8xf32>
    "tpu.trace_stop"() : () -> ()
    %cst_26 = arith.constant dense<0xFF800000> : vector<1x8xf32>
    %39 = vector.multi_reduction <maximumf>, %38, %cst_26 [2] : vector<1x8x8xf32> to vector<1x8xf32>
    %40 = vector.shape_cast %39 : vector<1x8xf32> to vector<1x8x1xf32>
    %41 = vector.broadcast %40 : vector<1x8x1xf32> to vector<1x8x8xf32>
    %42 = arith.subf %38, %41 : vector<1x8x8xf32>
    %43 = math.exp %42 : vector<1x8x8xf32>
    %cst_27 = arith.constant dense<0.000000e+00> : vector<1x8xf32>
    %44 = vector.multi_reduction <add>, %43, %cst_27 [2] : vector<1x8x8xf32> to vector<1x8xf32>
    %45 = vector.shape_cast %44 : vector<1x8xf32> to vector<1x8x1xf32>
    %46 = tpu.reciprocal %45 {approx = true} : vector<1x8x1xf32> -> vector<1x8x1xf32>
    %47 = vector.broadcast %46 : vector<1x8x1xf32> to vector<1x8x8xf32>
    %48 = arith.mulf %43, %47 : vector<1x8x8xf32>
    %49 = arith.truncf %48 : vector<1x8x8xf32> to vector<1x8x8xbf16>
    "tpu.trace_start"() <{level = 10 : i32, message = "bqk,bkd->bqd"}> : () -> ()
    %cst_28 = arith.constant dense<0.000000e+00> : vector<1x8x8xf32>
    %50 = tpu.matmul %49, %37, %cst_28 {dimension_numbers = #tpu.dot_dimension_numbers<[2], [1], [1], [2], [0, 0, 0, 1, 1, 2], [0], [0]>} : vector<1x8x8xbf16>, vector<1x8x8xbf16>, vector<1x8x8xf32> -> vector<1x8x8xf32>
    "tpu.trace_stop"() : () -> ()
    %51 = vector.shape_cast %50 : vector<1x8x8xf32> to vector<8x8xf32>
    %c0_29 = arith.constant 0 : index
    %c0_30 = arith.constant 0 : index
    %52 = vector.load %arg10[%c0_29, %c0_30] : memref<8x32xf32, #tpu.memory_space<vmem>>, vector<8x8xf32>
    tpu.vector_store %arg10[%c0_29, %c0_30], %51 {strides = array<i32>} : memref<8x32xf32, #tpu.memory_space<vmem>>, vector<8x8xf32>,
    %c0_31 = arith.constant 0 : index
    %c0_32 = arith.constant 0 : index
    %c8 = arith.constant 8 : index
    %53 = vector.load %arg9[%c0_31, %c0_32, %c8] : memref<1x8x96xbf16, #tpu.memory_space<vmem>>, vector<1x8x8xbf16>
    %c0_33 = arith.constant 0 : index
    %c0_34 = arith.constant 0 : index
    %c40 = arith.constant 40 : index
    %54 = vector.load %arg9[%c0_33, %c0_34, %c40] : memref<1x8x96xbf16, #tpu.memory_space<vmem>>, vector<1x8x8xbf16>
    %c0_35 = arith.constant 0 : index
    %c0_36 = arith.constant 0 : index
    %c72 = arith.constant 72 : index
    %55 = vector.load %arg9[%c0_35, %c0_36, %c72] : memref<1x8x96xbf16, #tpu.memory_space<vmem>>, vector<1x8x8xbf16>
    "tpu.trace_start"() <{level = 10 : i32, message = "bqd,bkd->bqk"}> : () -> ()
    %cst_37 = arith.constant dense<0.000000e+00> : vector<1x8x8xf32>
    %56 = tpu.matmul %53, %54, %cst_37 {dimension_numbers = #tpu.dot_dimension_numbers<[2], [2], [1], [1], [0, 0, 0, 1, 1, 1], [0], [0]>} : vector<1x8x8xbf16>, vector<1x8x8xbf16>, vector<1x8x8xf32> -> vector<1x8x8xf32>
    "tpu.trace_stop"() : () -> ()
    %cst_38 = arith.constant dense<0xFF800000> : vector<1x8xf32>
    %57 = vector.multi_reduction <maximumf>, %56, %cst_38 [2] : vector<1x8x8xf32> to vector<1x8xf32>
    %58 = vector.shape_cast %57 : vector<1x8xf32> to vector<1x8x1xf32>
    %59 = vector.broadcast %58 : vector<1x8x1xf32> to vector<1x8x8xf32>
    %60 = arith.subf %56, %59 : vector<1x8x8xf32>
    %61 = math.exp %60 : vector<1x8x8xf32>
    %cst_39 = arith.constant dense<0.000000e+00> : vector<1x8xf32>
    %62 = vector.multi_reduction <add>, %61, %cst_39 [2] : vector<1x8x8xf32> to vector<1x8xf32>
    %63 = vector.shape_cast %62 : vector<1x8xf32> to vector<1x8x1xf32>
    %64 = tpu.reciprocal %63 {approx = true} : vector<1x8x1xf32> -> vector<1x8x1xf32>
    %65 = vector.broadcast %64 : vector<1x8x1xf32> to vector<1x8x8xf32>
    %66 = arith.mulf %61, %65 : vector<1x8x8xf32>
    %67 = arith.truncf %66 : vector<1x8x8xf32> to vector<1x8x8xbf16>
    "tpu.trace_start"() <{level = 10 : i32, message = "bqk,bkd->bqd"}> : () -> ()
    %cst_40 = arith.constant dense<0.000000e+00> : vector<1x8x8xf32>
    %68 = tpu.matmul %67, %55, %cst_40 {dimension_numbers = #tpu.dot_dimension_numbers<[2], [1], [1], [2], [0, 0, 0, 1, 1, 2], [0], [0]>} : vector<1x8x8xbf16>, vector<1x8x8xbf16>, vector<1x8x8xf32> -> vector<1x8x8xf32>
    "tpu.trace_stop"() : () -> ()
    %69 = vector.shape_cast %68 : vector<1x8x8xf32> to vector<8x8xf32>
    %c0_41 = arith.constant 0 : index
    %c8_42 = arith.constant 8 : index
    %70 = vector.load %arg10[%c0_41, %c8_42] : memref<8x32xf32, #tpu.memory_space<vmem>>, vector<8x8xf32>
    tpu.vector_store %arg10[%c0_41, %c8_42], %69 {strides = array<i32>} : memref<8x32xf32, #tpu.memory_space<vmem>>, vector<8x8xf32>,
    %c0_43 = arith.constant 0 : index
    %c0_44 = arith.constant 0 : index
    %c16 = arith.constant 16 : index
    %71 = vector.load %arg9[%c0_43, %c0_44, %c16] : memref<1x8x96xbf16, #tpu.memory_space<vmem>>, vector<1x8x8xbf16>
    %c0_45 = arith.constant 0 : index
    %c0_46 = arith.constant 0 : index
    %c48 = arith.constant 48 : index
    %72 = vector.load %arg9[%c0_45, %c0_46, %c48] : memref<1x8x96xbf16, #tpu.memory_space<vmem>>, vector<1x8x8xbf16>
    %c0_47 = arith.constant 0 : index
    %c0_48 = arith.constant 0 : index
    %c80 = arith.constant 80 : index
    %73 = vector.load %arg9[%c0_47, %c0_48, %c80] : memref<1x8x96xbf16, #tpu.memory_space<vmem>>, vector<1x8x8xbf16>
    "tpu.trace_start"() <{level = 10 : i32, message = "bqd,bkd->bqk"}> : () -> ()
    %cst_49 = arith.constant dense<0.000000e+00> : vector<1x8x8xf32>
    %74 = tpu.matmul %71, %72, %cst_49 {dimension_numbers = #tpu.dot_dimension_numbers<[2], [2], [1], [1], [0, 0, 0, 1, 1, 1], [0], [0]>} : vector<1x8x8xbf16>, vector<1x8x8xbf16>, vector<1x8x8xf32> -> vector<1x8x8xf32>
    "tpu.trace_stop"() : () -> ()
    %cst_50 = arith.constant dense<0xFF800000> : vector<1x8xf32>
    %75 = vector.multi_reduction <maximumf>, %74, %cst_50 [2] : vector<1x8x8xf32> to vector<1x8xf32>
    %76 = vector.shape_cast %75 : vector<1x8xf32> to vector<1x8x1xf32>
    %77 = vector.broadcast %76 : vector<1x8x1xf32> to vector<1x8x8xf32>
    %78 = arith.subf %74, %77 : vector<1x8x8xf32>
    %79 = math.exp %78 : vector<1x8x8xf32>
    %cst_51 = arith.constant dense<0.000000e+00> : vector<1x8xf32>
    %80 = vector.multi_reduction <add>, %79, %cst_51 [2] : vector<1x8x8xf32> to vector<1x8xf32>
    %81 = vector.shape_cast %80 : vector<1x8xf32> to vector<1x8x1xf32>
    %82 = tpu.reciprocal %81 {approx = true} : vector<1x8x1xf32> -> vector<1x8x1xf32>
    %83 = vector.broadcast %82 : vector<1x8x1xf32> to vector<1x8x8xf32>
    %84 = arith.mulf %79, %83 : vector<1x8x8xf32>
    %85 = arith.truncf %84 : vector<1x8x8xf32> to vector<1x8x8xbf16>
    "tpu.trace_start"() <{level = 10 : i32, message = "bqk,bkd->bqd"}> : () -> ()
    %cst_52 = arith.constant dense<0.000000e+00> : vector<1x8x8xf32>
    %86 = tpu.matmul %85, %73, %cst_52 {dimension_numbers = #tpu.dot_dimension_numbers<[2], [1], [1], [2], [0, 0, 0, 1, 1, 2], [0], [0]>} : vector<1x8x8xbf16>, vector<1x8x8xbf16>, vector<1x8x8xf32> -> vector<1x8x8xf32>
    "tpu.trace_stop"() : () -> ()
    %87 = vector.shape_cast %86 : vector<1x8x8xf32> to vector<8x8xf32>
    %c0_53 = arith.constant 0 : index
    %c16_54 = arith.constant 16 : index
    %88 = vector.load %arg10[%c0_53, %c16_54] : memref<8x32xf32, #tpu.memory_space<vmem>>, vector<8x8xf32>
    tpu.vector_store %arg10[%c0_53, %c16_54], %87 {strides = array<i32>} : memref<8x32xf32, #tpu.memory_space<vmem>>, vector<8x8xf32>,
    %c0_55 = arith.constant 0 : index
    %c0_56 = arith.constant 0 : index
    %c24 = arith.constant 24 : index
    %89 = vector.load %arg9[%c0_55, %c0_56, %c24] : memref<1x8x96xbf16, #tpu.memory_space<vmem>>, vector<1x8x8xbf16>
    %c0_57 = arith.constant 0 : index
    %c0_58 = arith.constant 0 : index
    %c56 = arith.constant 56 : index
    %90 = vector.load %arg9[%c0_57, %c0_58, %c56] : memref<1x8x96xbf16, #tpu.memory_space<vmem>>, vector<1x8x8xbf16>
    %c0_59 = arith.constant 0 : index
    %c0_60 = arith.constant 0 : index
    %c88 = arith.constant 88 : index
    %91 = vector.load %arg9[%c0_59, %c0_60, %c88] : memref<1x8x96xbf16, #tpu.memory_space<vmem>>, vector<1x8x8xbf16>
    "tpu.trace_start"() <{level = 10 : i32, message = "bqd,bkd->bqk"}> : () -> ()
    %cst_61 = arith.constant dense<0.000000e+00> : vector<1x8x8xf32>
    %92 = tpu.matmul %89, %90, %cst_61 {dimension_numbers = #tpu.dot_dimension_numbers<[2], [2], [1], [1], [0, 0, 0, 1, 1, 1], [0], [0]>} : vector<1x8x8xbf16>, vector<1x8x8xbf16>, vector<1x8x8xf32> -> vector<1x8x8xf32>
    "tpu.trace_stop"() : () -> ()
    %cst_62 = arith.constant dense<0xFF800000> : vector<1x8xf32>
    %93 = vector.multi_reduction <maximumf>, %92, %cst_62 [2] : vector<1x8x8xf32> to vector<1x8xf32>
    %94 = vector.shape_cast %93 : vector<1x8xf32> to vector<1x8x1xf32>
    %95 = vector.broadcast %94 : vector<1x8x1xf32> to vector<1x8x8xf32>
    %96 = arith.subf %92, %95 : vector<1x8x8xf32>
    %97 = math.exp %96 : vector<1x8x8xf32>
    %cst_63 = arith.constant dense<0.000000e+00> : vector<1x8xf32>
    %98 = vector.multi_reduction <add>, %97, %cst_63 [2] : vector<1x8x8xf32> to vector<1x8xf32>
    %99 = vector.shape_cast %98 : vector<1x8xf32> to vector<1x8x1xf32>
    %100 = tpu.reciprocal %99 {approx = true} : vector<1x8x1xf32> -> vector<1x8x1xf32>
    %101 = vector.broadcast %100 : vector<1x8x1xf32> to vector<1x8x8xf32>
    %102 = arith.mulf %97, %101 : vector<1x8x8xf32>
    %103 = arith.truncf %102 : vector<1x8x8xf32> to vector<1x8x8xbf16>
    "tpu.trace_start"() <{level = 10 : i32, message = "bqk,bkd->bqd"}> : () -> ()
    %cst_64 = arith.constant dense<0.000000e+00> : vector<1x8x8xf32>
    %104 = tpu.matmul %103, %91, %cst_64 {dimension_numbers = #tpu.dot_dimension_numbers<[2], [1], [1], [2], [0, 0, 0, 1, 1, 2], [0], [0]>} : vector<1x8x8xbf16>, vector<1x8x8xbf16>, vector<1x8x8xf32> -> vector<1x8x8xf32>
    "tpu.trace_stop"() : () -> ()
    %105 = vector.shape_cast %104 : vector<1x8x8xf32> to vector<8x8xf32>
    %c0_65 = arith.constant 0 : index
    %c24_66 = arith.constant 24 : index
    %106 = vector.load %arg10[%c0_65, %c24_66] : memref<8x32xf32, #tpu.memory_space<vmem>>, vector<8x8xf32>
    tpu.vector_store %arg10[%c0_65, %c24_66], %105 {strides = array<i32>} : memref<8x32xf32, #tpu.memory_space<vmem>>, vector<8x8xf32>,
    %c0_67 = arith.constant 0 : index
    %c0_68 = arith.constant 0 : index
    %107 = vector.load %arg10[%c0_67, %c0_68] : memref<8x32xf32, #tpu.memory_space<vmem>>, vector<8x32xf32>
    %108 = arith.truncf %107 : vector<8x32xf32> to vector<8x32xbf16>
    %c0_69 = arith.constant 0 : index
    %c0_70 = arith.constant 0 : index
    %109 = vector.load %arg6[%c0_69, %c0_70] : memref<32x32xbf16, #tpu.memory_space<vmem>>, vector<32x32xbf16>
    %cst_71 = arith.constant dense<0.000000e+00> : vector<8x32xf32>
    %110 = tpu.matmul %108, %109, %cst_71 {dimension_numbers = #tpu.dot_dimension_numbers<[1], [0], [0], [1], [0, 0, 1, 1], [], []>} : vector<8x32xbf16>, vector<32x32xbf16>, vector<8x32xf32> -> vector<8x32xf32>
    %c0_72 = arith.constant 0 : index
    %c0_73 = arith.constant 0 : index
    %111 = vector.load %arg7[%c0_72, %c0_73] : memref<1x32xf32, #tpu.memory_space<vmem>>, vector<1x32xf32>
    %112 = vector.broadcast %111 : vector<1x32xf32> to vector<8x32xf32>
    %113 = arith.addf %110, %112 : vector<8x32xf32>
    %114 = vector.shape_cast %113 : vector<8x32xf32> to vector<1x8x32xf32>
    %c0_74 = arith.constant 0 : index
    %c0_75 = arith.constant 0 : index
    %c0_76 = arith.constant 0 : index
    %115 = vector.load %arg8[%c0_74, %c0_75, %c0_76] : memref<1x8x32xf32, #tpu.memory_space<vmem>>, vector<1x8x32xf32>
    tpu.vector_store %arg8[%c0_74, %c0_75, %c0_76], %114 {strides = array<i32>} : memref<1x8x32xf32, #tpu.memory_space<vmem>>, vector<1x8x32xf32>,
    return
  }
  func.func @transform_0(%arg0: i32) -> (i32, i32, i32) {
    %c0_i32 = arith.constant 0 : i32
    %c0_i32_0 = arith.constant 0 : i32
    %c0_i32_1 = arith.constant 0 : i32
    return %arg0, %c0_i32, %c0_i32_0 : i32, i32, i32
  }
  func.func @transform_1(%arg0: i32) -> (i32, i32) {
    %c0_i32 = arith.constant 0 : i32
    %c0_i32_0 = arith.constant 0 : i32
    %c0_i32_1 = arith.constant 0 : i32
    return %c0_i32, %c0_i32_0 : i32, i32
  }
  func.func @transform_2(%arg0: i32) -> (i32, i32) {
    %c0_i32 = arith.constant 0 : i32
    %c0_i32_0 = arith.constant 0 : i32
    %c0_i32_1 = arith.constant 0 : i32
    return %c0_i32, %c0_i32_0 : i32, i32
  }
  func.func @transform_3(%arg0: i32) -> (i32, i32) {
    %c0_i32 = arith.constant 0 : i32
    %c0_i32_0 = arith.constant 0 : i32
    %c0_i32_1 = arith.constant 0 : i32
    return %c0_i32, %c0_i32_0 : i32, i32
  }
  func.func @transform_4(%arg0: i32) -> (i32, i32) {
    %c0_i32 = arith.constant 0 : i32
    %c0_i32_0 = arith.constant 0 : i32
    %c0_i32_1 = arith.constant 0 : i32
    return %c0_i32, %c0_i32_0 : i32, i32
  }
  func.func @transform_5(%arg0: i32) -> (i32, i32) {
    %c0_i32 = arith.constant 0 : i32
    %c0_i32_0 = arith.constant 0 : i32
    %c0_i32_1 = arith.constant 0 : i32
    return %c0_i32, %c0_i32_0 : i32, i32
  }
  func.func @transform_6(%arg0: i32) -> (i32, i32) {
    %c0_i32 = arith.constant 0 : i32
    %c0_i32_0 = arith.constant 0 : i32
    %c0_i32_1 = arith.constant 0 : i32
    return %c0_i32, %c0_i32_0 : i32, i32
  }
  func.func @transform_7(%arg0: i32) -> (i32, i32, i32) {
    %c0_i32 = arith.constant 0 : i32
    %c0_i32_0 = arith.constant 0 : i32
    %c0_i32_1 = arith.constant 0 : i32
    return %arg0, %c0_i32, %c0_i32_0 : i32, i32, i32
  }
}

</mosaic_0001>

<bundles_post_ra>
// kernel: tpu_custom_call.1
= control target key start
LH: loop header
LB: loop body
LE: loop exit
PB: predicated region body
PF: predicated region fallthrough
CT: control target
= control target key end

     0   :  { %s1794_s0 = inlined_call_operand.hbm [shape: f32[2,8,32], index: 0, kind: input, shape index: {}]   ;;  %s1795_s1 = inlined_call_operand.vmem [shape: f32[1,32], index: 1, kind: input, shape index: {}]   ;;  %s1796_s2 = inlined_call_operand.vmem [shape: f32[1,32], index: 2, kind: input, shape index: {}]   ;;  %s1797_s3 = inlined_call_operand.hbm [shape: bf16[32,96], index: 3, kind: input, shape index: {}]   ;;  %s1798_s4 = inlined_call_operand.vmem [shape: f32[1,96], index: 4, kind: input, shape index: {}]   ;;  %s1799_s5 = inlined_call_operand.hbm [shape: bf16[32,32], index: 5, kind: input, shape index: {}]   ;;  %s1800_s6 = inlined_call_operand.vmem [shape: f32[1,32], index: 6, kind: input, shape index: {}]   ;;  %s1801_s7 = inlined_call_operand.hbm [shape: f32[2,8,32], index: 7, kind: output, shape index: {}]  }
   0x1   :  { %1806 = sst [smem:[#allocation14_spill]] %s1797_s3 }
   0x2   :  { %1807 = sst [smem:[#allocation15_spill]] %s1799_s5 }
   0x3   :  { %12 = vsyncpa [#allocation5], 0 }
   0x4   :  { %14 = vsyncpa [#allocation5 + $0x1], 0 }
   0x5   :  { %15 = vsyncpa [#allocation8], 0 }
   0x6   :  { %16 = vsyncpa [#allocation6], 0 }
   0x7   :  { %18 = vsyncpa [#allocation6 + $0x1], 0  ;;  %s1520_s24 = smov 0   ;;  %s1522_s25 = smov 0  }
   0x8   :  { %s1524_s26 = smov 0   ;;  %s1526_s27 = smov 0  }
   0x9 LB: > { %s1541_s28 = sadd.s32 4294967295, %s1456_s27   ;;  %s1073_s29 = sadd.s32 4294967294, %s1456_s27   ;;  %s1456_s27 = sphi %s1526_s27, %s1827_s27   ;;  %s1452_s26 = sphi %s1524_s26, %s1826_s26   ;;  %s1448_s25 = sphi %s1522_s25, %s1825_s25   ;;  %s1444_s24 = sphi %s1520_s24, %s1824_s24  }
   0xa   : > { %p44_p0 = scmp.ne.s32.totalorder %s1448_s25, %s1444_s24  ;;  %p1802_p1 = scmp.eq.s32.totalorder %s1541_s28, 0 }
   0xb   : > { %p200_p3 = scmp.eq.s32.totalorder %s1073_s29, 1  ;;  %p1074_p5 = scmp.ge.s32.totalorder %s1456_s27, 1 }
   0xc   : > { %p1550_p4 = por %p1802_p1, %p44_p0  ;;  %p207_p7 = scmp.lt.s32.totalorder %s1456_s27, 3 }
   0xd   : > { %p1555_p6 = por %p200_p3, %p44_p0  ;;  %s1458_s10 = smov [#allocation7]  }
   0xe   : > { %s1808_s30 = scalar_select %p1550_p4, 1, 0 }
   0xf   : > { %s1809_s8 = scalar_select %p1555_p6, 1, 0 }
  0x10   : > { %p1560_p8 = pnand %p1074_p5, %p207_p7  ;;  %s225_s11 = sshll.u32 %s1458_s10, 4  ;;  %s226_s11 = int_to_ptr.vmem [resolvable:$true] %s225_s11 }
  0x11   : > { %s1459_s13 = smov [#allocation9]   ;;  %s1319_s15 = scalar_lea.vmem %s226_s11, 256 }
  0x12   : > { %s1810_s9 = scalar_select %p1560_p8, 1, 0 }
  0x13   : > { %p1209_p9 = pneg %p1560_p8  ;;  %s241_s14 = sshll.u32 %s1459_s13, 4  ;;  %s242_s14 = int_to_ptr.vmem [resolvable:$true] %s241_s14 }
  0x14   : > { %p1320_p13 = scmp.ne.s32.totalorder %s226_s11, %s1319_s15  ;;  %p1327_p5 = scmp.lt.s32.totalorder %s226_s11, %s226_s11 }
  0x15   : > { %p1569_p11 = pnand %p1209_p9, %p1802_p1  ;;  %p1328_p7 = scmp.lt.s32.totalorder %s1319_s15, %s1319_s15 }
  0x17   : > { %p1310_p12 = pneg %p1569_p11  ;;  %p1329_p10 = por %p1328_p7, %p1327_p5 }
  0x19   : > { %p1322_p0 = pnand %p1320_p13, %p1310_p12 }
  0x1b   : > { %p1323_p3 = pneg %p1322_p0 }
  0x1d   : > { %p1330_p9 = pnand %p1329_p10, %p1323_p3 }
  0x1f   : > { %1333 = shalt.err (!%p1330_p9)
}
  0x20   : > { %s1460_s16 = smov 64   ;;  %s1461_s17 = smov 4  }
  0x21   : > { %s1812_s3 = sld [smem:[#allocation14_spill]]  ;;  %s1345_s20 = scalar_lea.vmem %s242_s14, 256 }
  0x22   : > { %p1346_p1 = scmp.ne.s32.totalorder %s242_s14, %s1345_s20  ;;  %p1353_p2 = scmp.lt.s32.totalorder %s242_s14, %s242_s14 }
  0x23   : > { %p1354_p6 = scmp.lt.s32.totalorder %s1345_s20, %s1345_s20 }
  0x24   : > { %p1348_p13 = pnand %p1346_p1, %p1310_p12 }
  0x25   : > { %p1355_p5 = por %p1354_p6, %p1353_p2 }
  0x26   : > { %p1349_p0 = pneg %p1348_p13 }
  0x27   : > { %1212 = dma.hbm_to_vmem [thread:$0]  (!%p1569_p11), %s1812_s3, 256, %s226_s11, [#allocation8], %s1460_s16, %s1460_s16, %s1461_s17  }
  0x28   : > { %p1356_p10 = pnand %p1355_p5, %p1349_p0 }
  0x2a   : > { %1359 = shalt.err (!%p1356_p10)
}
  0x2b   : > { %s1813_s5 = sld [smem:[#allocation15_spill]]  ;;  %s1592_s23 = sadd.s32 1, %s1456_s27  }
  0x2c   : > { %s31_s29 = sadd.s32 1, %s1452_s26  ;;  %s28_s10 = ssub.s32 %s1456_s27, %s1592_s23 }
  0x2d   : > { %p38_p1 = scmp.ne.s32.totalorder %s1452_s26, %s1448_s25  ;;  %p29_p2 = scmp.eq.s32.totalorder %s28_s10, 0 }
  0x2e   : > { %p39_p6 = scmp.eq.s32.totalorder %s1456_s27, 0  ;;  %p1814_p12 = scmp.eq.s32.totalorder %s1541_s28, 1 }
  0x2f   : > { %p1226_p7 = scmp.lt.s32.totalorder %s1456_s27, 2  ;;  %s258_s13 = sand.u32 1, %s1452_s26  }
  0x30   : > { %p1602_p3 = por %p1814_p12, %p38_p1  ;;  %p40_p9 = por %p39_p6, %p38_p1 }
  0x31   : > { %1215 = dma.hbm_to_vmem [thread:$0]  (!%p1569_p11), %s1813_s5, 256, %s242_s14, [#allocation8], %s1460_s16, %s1460_s16, %s1461_s17  }
  0x32   : > { %s1815_s11 = scalar_select %p1602_p3, 1, 0 }
  0x33   : > { %s1608_s12 = scalar_select %p29_p2, %s1452_s26, %s31_s29  }
  0x34   : > { %s1078_s15 = sshll.u32 %s258_s13, 3  ;;  %s1079_s14 = sshll.u32 %s1456_s27, 7 }
  0x35   : > { %s1615_s18 = scalar_lea.hbm %s1794_s0, %s1079_s14  ;;  %s262_s19 = scalar_lea.vmem [#allocation4], %s1078_s15 }
  0x36   : > { %s269_s20 = sshll.u32 %s262_s19, 4  ;;  %p1617_p11 = pnand %p1226_p7, %p40_p9  ;;  %s270_s20 = int_to_ptr.vmem [resolvable:$true] %s269_s20 }
  0x37   : > { %s259_s22 = scalar_lea.sflag [#allocation5], %s258_s13  ;;  %s1360_s29 = scalar_lea.hbm %s1615_s18, 128 }
  0x38   : > { %p1361_p13 = scmp.ne.s32.totalorder %s1615_s18, %s1360_s29  ;;  %p1362_p0 = pneg %p1617_p11 }
  0x39   : > { %s1365_s16 = scalar_lea.hbm %s1794_s0, 256  ;;  %p1366_p1 = scmp.lt.s32.totalorder %s1615_s18, %s1794_s0 }
  0x3a   : > { %p1363_p5 = pnand %p1362_p0, %p1361_p13  ;;  %p1367_p2 = scmp.lt.s32.totalorder %s1365_s16, %s1360_s29 }
  0x3c   : > { %p1364_p10 = pneg %p1363_p5  ;;  %p1368_p6 = por %p1367_p2, %p1366_p1 }
  0x3e   : > { %p1369_p12 = pnand %p1368_p6, %p1364_p10 }
  0x40   : > { %1372 = shalt.err (!%p1369_p12)
}
  0x41   : > { %s1373_s19 = scalar_lea.vmem %s270_s20, 128  ;;  %s1462_s13 = smov [#allocation4]  }
  0x42   : > { %p1374_p7 = scmp.ne.s32.totalorder %s270_s20, %s1373_s19  ;;  %s1378_s3 = sshll.u32 %s1462_s13, 4  ;;  %s1379_s3 = int_to_ptr.vmem [resolvable:$false] %s1378_s3 }
  0x43   : > { %s1380_s5 = scalar_lea.vmem %s1379_s3, 256  ;;  %p1381_p13 = scmp.lt.s32.totalorder %s270_s20, %s1379_s3 }
  0x44   : > { %p1376_p9 = pnand %p1374_p7, %p1362_p0  ;;  %p1382_p5 = scmp.lt.s32.totalorder %s1380_s5, %s1373_s19 }
  0x46   : > { %p1377_p3 = pneg %p1376_p9  ;;  %p1383_p4 = por %p1382_p5, %p1381_p13 }
  0x48   : > { %p1384_p8 = pnand %p1383_p4, %p1377_p3 }
  0x4a   : > { %1387 = shalt.err (!%p1384_p8)
}
  0x4b   : > { %1219 = dma.hbm_to_vmem [thread:$0]  (!%p1617_p11), %s1615_s18, 128, %s270_s20, %s259_s22  }
  0x4c   : > { %p1817_p10 = scmp.ne.s32.totalorder %s1810_s9, 0 }
  0x4d   : > { %s1638_s29 = sand.u32 (!%p1817_p10), 1, %s1448_s25   ;;  %p1818_p4 = scmp.ne.s32.totalorder (!%p1817_p10), %s1808_s30, 0 }
  0x4e   : > { %278 = sbr.rel (%p1817_p10) target bundleno = 1824 (0x720), region = 48  ;;  %s1081_s10 = sshll.u32 (!%p1817_p10), %s1638_s29, 3 }
  0x4f   : > { %s281_s3 = scalar_lea.sflag (!%p1817_p10), [#allocation5], %s1638_s29  ;;  %s284_s5 = scalar_lea.vmem (!%p1817_p10), [#allocation4], %s1081_s10 }
  0x53   : > { %1431 = dma.done.wait (%p1818_p4), %s281_s3, 128  }
  0x54   : > { %1433 = vsyncadd (%p1818_p4), %s281_s3, 4294967168  ;;  %p1819_p8 = scmp.eq.s32.totalorder %s1541_s28, 0 }
  0x56   : > { %1435 = dma.done.wait (%p1819_p8), [#allocation8], 512   ;;  %p1820_p3 = pmov %p1819_p8 }
  0x57   : > { %vm325_vm0 = vcmask 261120   ;;  %v324_v0 = vld [vmem:[%s284_s5] sm:$0xff]  ;;  %v1282_v7 = vld [vmem:[#allocation7 + $0x8] sm:$0xff]   ;;  %v1463_v8 = vmov 0.0   ;;  %vm1464_vm1 = vmmov 0   ;;  %v1283_v9 = vld [vmem:[#allocation7] sm:$0xff]  }
  0x58   : > { %1437 = vsyncadd (%p1820_p3), [#allocation8], 4294966784  ;;  %v326_v1 = vsel %vm325_vm0, %v324_v0, 0.0  ;;  %1133 = vmatprep.subr.bf16.mxu0 %v1463_v8  ;;  %1137 = vmatprep.mubr.msk.bf16.mxu0 %vm1464_vm1, %v1463_v8  ;;  %v1085_v14 = vld [vmem:[%s1795_s1] ss:$0 sm:$0xff]  ;;  %vm424_vm2 = vcmask 781312  }
  0x59   : > { %327 = vadd.xlane.f32.xlu0 %v326_v1  ;;  %1134 = vmatpush3.bf16.msra.mxu0 %v1282_v7  ;;  %v1086_v16 = vld [vmem:[%s1796_s2] ss:$0 sm:$0xff]  ;;  %s1465_s14 = smov 120   ;;  %s1466_s16 = smov 96   ;;  %vm432_vm3 = vcmask 64512   ;;  %vm496_vm4 = vcmask 1043456  }
  0x5a   : > { %1141 = vmatprep.subr.bf16.mxu1 %v1463_v8  ;;  %1135 = vmatprep.subr.bf16.mxu0 %v1463_v8  ;;  %v1087_v20 = vld [vmem:[%s1798_s4] ss:$0 sm:$0xff]  ;;  %s1467_s17 = smov 88   ;;  %s1468_s15 = smov 80   ;;  %vm659_vm5 = vcmask 130112   ;;  %vm779_vm6 = vcmask 195712  }
  0x5b   : > { %1143 = vmatprep.mubr.msk.bf16.mxu1 %vm1464_vm1, %v1463_v8  ;;  %s1469_s19 = smov 112   ;;  %s1470_s13 = smov 72   ;;  %vm899_vm7 = vcmask 261312  }
  0x5c   : > { %s1471_s3 = smov 104   ;;  %s1472_s5 = smov 64  }
  0x5d   : > { %1136 = vmatpush3.bf16.msra.mxu0 %v1283_v9  ;;  %s1473_s30 = smov 56   ;;  %s1474_s9 = smov 48  }
  0x5e   : > { %1147 = vmatprep.subr.bf16.mxu0 %v1463_v8  ;;  %s1475_s18 = smov 40   ;;  %s1476_s20 = smov 8  }
  0x5f   : > { %s1477_s21 = smov 16   ;;  %s1478_s22 = smov 24  }
  0x60   : > { %p1821_p0 = scmp.ne.s32.totalorder %s1815_s11, 0 }
  0xe2   : > { %v328_v2 = vpop.xlane.xlu0 %327 }
  0xe3   : > { %v330_v3 = vmul.f32 0.03125, %v328_v2 }
  0xe5   : > { %v331_v4 = vsub.f32 %v324_v0, %v330_v3 }
  0xe7   : > { %v332_v5 = vmul.f32 %v331_v4, %v331_v4 }
  0xe9   : > { %v333_v6 = vsel %vm325_vm0, %v332_v5, 0.0 }
  0xea   : > { %334 = vadd.xlane.f32.xlu0 %v333_v6 }
 0x173   : > { %v335_v10 = vpop.xlane.xlu0 %334 }
 0x174   : > { %v336_v11 = vmul.f32 0.03125, %v335_v10 }
 0x176   : > { %v337_v12 = vadd.f32 1e-05, %v336_v11 }
 0x178   : > { %1290 = vrsqrt.f32 %v337_v12 }
 0x185   : > { %v1291_v13 = vpop.eup %1290 }
 0x186   : > { %v339_v15 = vmul.f32 %v1291_v13, %v331_v4 }
 0x188   : > { %v347_v17 = vmul.f32 %v1085_v14, %v339_v15 }
 0x18a   : > { %v355_v18 = vadd.f32 %v1086_v16, %v347_v17 }
 0x18c   : > { %v356_v19 = vpack.c.bf16 %v355_v18, %v355_v18 }
 0x18e   : > { %1138 = vmatmul.mubr.msk.bf16.vlgmr.msra.gmra.mxu0 %vm325_vm0, %v356_v19 }
 0x18f   : > { %1149 = vmatprep.mubr.msk.bf16.mxu0 %vm1464_vm1, %v1463_v8 }
 0x24e   : > { %v417_v21 = vpop.f32.mrf.mxu0 }
 0x24f   : > { %v418_v22 = vadd.f32 %v1087_v20, %v417_v21 }
 0x250   : > { %v1139_v23 = vpop.f32.mrf.mxu0 }
 0x251   : > { %v423_v24 = vpack.c.bf16 %v418_v22, %v418_v22 }
 0x252   : > { %v420_v25 = vpop.f32.mrf.mxu0 }
 0x253   : > { %425 = vst.msk [vmem:[#allocation2] sm:$0xf] %vm424_vm2, %v423_v24 }
 0x254   : > { %v1140_v26 = vpop.f32.mrf.mxu0 }
 0x25a   : > { %v1674_v27 = vld [vmem:[#allocation2] ss:$0 sps:$4 sm:$0xff]  }
 0x25b   : > { %v426_v28 = vld [vmem:[#allocation2] sm:$0xf]  ;;  %545 = vrot.lane.b32.xlu0 %v1674_v27, %s1465_s14 }
 0x25c   : > { %v1676_v29 = vcombine.low %v426_v28, %v426_v28  ;;  %v1681_v30 = vld [vmem:[#allocation2] ss:$0 sps:$4 sm:$0xff]  }
 0x25d   : > { %v1685_v31 = vld [vmem:[#allocation2] ss:$0 sps:$4 sm:$0xff]  }
 0x25e   : > { %430 = vrot.lane.b32.xlu1 %v1676_v29, %s1466_s16 }
 0x262   : > { %547 = vrot.lane.b32.xlu1 %v1674_v27, %s1467_s17  ;;  %s1108_s17 = sshll.u32 %s1541_s28, 7  ;;  %s971_s28 = scalar_lea.sflag [#allocation6], %s1638_s29 }
 0x266   : > { %667 = vrot.lane.b32.xlu1 %v1681_v30, %s1468_s15  ;;  %s322_s15 = scalar_lea.vmem [#allocation10], %s1081_s10  ;;  %s1479_s10 = smov [#allocation10]  }
 0x26a   : > { %665 = vrot.lane.b32.xlu1 %v1681_v30, %s1469_s19  ;;  %s984_s19 = sshll.u32 %s322_s15, 4  ;;  %s1752_s19 = int_to_ptr.vmem [resolvable:$true] %s984_s19 }
 0x26e   : > { %787 = vrot.lane.b32.xlu1 %v1685_v31, %s1470_s13 }
 0x272   : > { %785 = vrot.lane.b32.xlu1 %v1685_v31, %s1471_s3 }
 0x2cd   : > { %v546_v37 = vpop.permute.xlu0 %545 }
 0x2d0   : > { %v431_v32 = vpop.permute.xlu1 %430 }
 0x2d1   : > { %v437_v33 = vsel %vm432_vm3, %v431_v32, 0 }
 0x2d2   : > { %1142 = vmatpush3.bf16.xpose.msra.mxu1 %v437_v33 }
 0x2d3   : > { %1153 = vmatprep.subr.bf16.mxu1 %v1463_v8 }
 0x2d4   : > { %v548_v34 = vpop.permute.xlu1 %547 }
 0x2d5   : > { %v553_v35 = vsel %vm432_vm3, %v548_v34, 0 }
 0x2d8   : > { %v668_v36 = vpop.permute.xlu1 %667 }
 0x2d9   : > { %1144 = vmatmul.mubr.msk.bf16.vlgmr.msra.gmra.mxu1 %vm432_vm3, %v426_v28  ;;  %v673_v39 = vsel %vm432_vm3, %v668_v36, 0 }
 0x2da   : > { %1154 = vmatpush3.bf16.xpose.msra.mxu1 %v553_v35  ;;  %1155 = vmatprep.mubr.msk.bf16.mxu1 %vm1464_vm1, %v1463_v8 }
 0x2db   : > { %1165 = vmatprep.subr.bf16.mxu1 %v1463_v8 }
 0x2dc   : > { %v666_v38 = vpop.permute.xlu1 %665 }
 0x2e0   : > { %v788_v40 = vpop.permute.xlu1 %787 }
 0x2e1   : > { %1156 = vmatmul.mubr.msk.bf16.vlgmr.msra.gmra.mxu1 %vm432_vm3, %v546_v37  ;;  %v793_v41 = vsel %vm432_vm3, %v788_v40, 0 }
 0x2e2   : > { %1166 = vmatpush3.bf16.xpose.msra.mxu1 %v673_v39  ;;  %1167 = vmatprep.mubr.msk.bf16.mxu1 %vm1464_vm1, %v1463_v8 }
 0x2e3   : > { %1177 = vmatprep.subr.bf16.mxu1 %v1463_v8 }
 0x2e4   : > { %v786_v42 = vpop.permute.xlu1 %785 }
 0x2e9   : > { %1168 = vmatmul.mubr.msk.bf16.vlgmr.msra.gmra.mxu1 %vm432_vm3, %v666_v38 }
 0x2ea   : > { %1178 = vmatpush3.bf16.xpose.msra.mxu1 %v793_v41  ;;  %1179 = vmatprep.mubr.msk.bf16.mxu1 %vm1464_vm1, %v1463_v8 }
 0x2eb   : > { %1189 = vmatprep.subr.bf16.mxu1 %v1463_v8 }
 0x2f1   : > { %1180 = vmatmul.mubr.msk.bf16.vlgmr.msra.gmra.mxu1 %vm432_vm3, %v786_v42 }
 0x2f2   : > { %1193 = vmatprep.mubr.msk.bf16.mxu1 %vm1464_vm1, %v1463_v8 }
 0x399   : > { %v473_v43 = vpop.f32.mrf.mxu1 }
 0x39a   : > { %v479_v44 = vsel %vm432_vm3, %v473_v43, -inf }
 0x39b   : > { %480 = vmax.xlane.f32.xlu1 %v479_v44  ;;  %v1145_v45 = vpop.f32.mrf.mxu1 }
 0x39d   : > { %v476_v46 = vpop.f32.mrf.mxu1 }
 0x39f   : > { %v1146_v47 = vpop.f32.mrf.mxu1 }
 0x3a1   : > { %v589_v48 = vpop.f32.mrf.mxu1 }
 0x3a2   : > { %v595_v49 = vsel %vm432_vm3, %v589_v48, -inf }
 0x3a3   : > { %596 = vmax.xlane.f32.xlu0 %v595_v49  ;;  %v1157_v50 = vpop.f32.mrf.mxu1 }
 0x3a5   : > { %v592_v51 = vpop.f32.mrf.mxu1 }
 0x3a7   : > { %v1158_v52 = vpop.f32.mrf.mxu1 }
 0x3a8   : > { %v1288_v52 = vld [vmem:[#allocation9 + $0x8] sm:$0xff]  }
 0x3a9   : > { %v709_v53 = vpop.f32.mrf.mxu1  ;;  %1190 = vmatpush3.bf16.msra.mxu1 %v1288_v52 }
 0x3aa   : > { %v715_v54 = vsel %vm432_vm3, %v709_v53, -inf  ;;  %1191 = vmatprep.subr.bf16.mxu1 %v1463_v8 }
 0x3ab   : > { %716 = vmax.xlane.f32.xlu1 %v715_v54  ;;  %v1169_v55 = vpop.f32.mrf.mxu1 }
 0x3ad   : > { %v712_v56 = vpop.f32.mrf.mxu1 }
 0x3af   : > { %v1170_v57 = vpop.f32.mrf.mxu1 }
 0x3b1   : > { %v829_v58 = vpop.f32.mrf.mxu1 }
 0x3b2   : > { %v835_v59 = vsel %vm432_vm3, %v829_v58, -inf }
 0x3b3   : > { %836 = vmax.xlane.f32.xlu0 %v835_v59  ;;  %v1181_v60 = vpop.f32.mrf.mxu1 }
 0x3b5   : > { %v832_v61 = vpop.f32.mrf.mxu1 }
 0x3b7   : > { %v1182_v62 = vpop.f32.mrf.mxu1 }
 0x424   : > { %v481_v63 = vpop.xlane.xlu1 %480 }
 0x425   : > { %v482_v0 = vsub.f32 %v473_v43, %v481_v63 }
 0x427   : > { %v483_v1 = vmul.f32 1.442695, %v482_v0 }
 0x429   : > { %1292 = vpow2.f32 %v483_v1 }
 0x42c   : > { %v597_v2 = vpop.xlane.xlu0 %596 }
 0x42d   : > { %v598_v3 = vsub.f32 %v589_v48, %v597_v2  ;;  %v1103_v2 = vld [vmem:[%s1800_s6] ss:$0 sm:$0xff] }
 0x42f   : > { %v599_v4 = vmul.f32 1.442695, %v598_v3 }
 0x431   : > { %1294 = vpow2.f32 %v599_v4 }
 0x434   : > { %v717_v15 = vpop.xlane.xlu1 %716 }
 0x435   : > { %v718_v16 = vsub.f32 %v709_v53, %v717_v15  ;;  %v1289_v53 = vld [vmem:[#allocation9] sm:$0xff]  }
 0x436   : > { %v1293_v5 = vpop.eup %1292  ;;  %1192 = vmatpush3.bf16.msra.mxu1 %v1289_v53 }
 0x437   : > { %v485_v6 = vsel %vm432_vm3, %v1293_v5, 0.0  ;;  %v719_v17 = vmul.f32 1.442695, %v718_v16 }
 0x438   : > { %486 = vadd.xlane.f32.xlu1 %v485_v6 }
 0x43c   : > { %v837_v7 = vpop.xlane.xlu0 %836 }
 0x43d   : > { %v838_v9 = vsub.f32 %v829_v58, %v837_v7 }
 0x43e   : > { %v1295_v10 = vpop.eup %1294 }
 0x43f   : > { %v839_v11 = vmul.f32 1.442695, %v838_v9  ;;  %v601_v12 = vsel %vm432_vm3, %v1295_v10, 0.0 }
 0x440   : > { %602 = vadd.xlane.f32.xlu0 %v601_v12 }
 0x441   : > { %1296 = vpow2.f32 %v839_v11 }
 0x442   : > { %1298 = vpow2.f32 %v719_v17 }
 0x449   : > { %491 = vrot.lane.b32.xlu1 %v1676_v29, %s1472_s5  ;;  %s1750_s5 = scalar_lea.hbm %s1801_s7, %s1108_s17 }
 0x44e   : > { %v1297_v13 = vpop.eup %1296 }
 0x44f   : > { %v841_v14 = vsel %vm432_vm3, %v1297_v13, 0.0  ;;  %v1299_v18 = vpop.eup %1298 }
 0x450   : > { %842 = vadd.xlane.f32.xlu0 %v841_v14  ;;  %v721_v19 = vsel %vm432_vm3, %v1299_v18, 0.0 }
 0x466   : > { %607 = vrot.lane.b32.xlu0 %v1674_v27, %s1473_s30  ;;  %s1388_s30 = scalar_lea.vmem %s1752_s19, 128 }
 0x467   : > { %p1389_p11 = scmp.ne.s32.totalorder %s1752_s19, %s1388_s30 }
 0x469   : > { %p1390_p1 = pnand %p1389_p11, %p1821_p0 }
 0x46b   : > { %p1391_p2 = pneg %p1390_p1 }
 0x46d   : > { %722 = vadd.xlane.f32.xlu1 %v721_v19 }
 0x47e   : > { %727 = vrot.lane.b32.xlu1 %v1681_v30, %s1474_s9  ;;  %s1392_s9 = sshll.u32 %s1479_s10, 4  ;;  %s1393_s9 = int_to_ptr.vmem [resolvable:$false] %s1392_s9 }
 0x47f   : > { %p1395_p6 = scmp.lt.s32.totalorder %s1752_s19, %s1393_s9 }
 0x482   : > { %847 = vrot.lane.b32.xlu1 %v1685_v31, %s1475_s18  ;;  %s1394_s18 = scalar_lea.vmem %s1393_s9, 256 }
 0x483   : > { %p1396_p12 = scmp.lt.s32.totalorder %s1394_s18, %s1388_s30 }
 0x485   : > { %p1397_p7 = por %p1396_p12, %p1395_p6 }
 0x487   : > { %p1398_p9 = pnand %p1397_p7, %p1391_p2 }
 0x4c1   : > { %v487_v20 = vpop.xlane.xlu1 %486 }
 0x4c2   : > { %1300 = vrcp.f32 %v487_v20 }
 0x4c5   : > { %v492_v21 = vpop.permute.xlu1 %491 }
 0x4c6   : > { %v498_v22 = vsel %vm496_vm4, %v492_v21, 0 }
 0x4c7   : > { %1148 = vmatpush3.bf16.msra.mxu0 %v498_v22 }
 0x4c8   : > { %1159 = vmatprep.subr.bf16.mxu0 %v1463_v8 }
 0x4c9   : > { %v603_v23 = vpop.xlane.xlu0 %602 }
 0x4ca   : > { %1302 = vrcp.f32 %v603_v23 }
 0x4cf   : > { %v1301_v24 = vpop.eup %1300 }
 0x4d0   : > { %v489_v25 = vmul.f32 %v1301_v24, %v1293_v5 }
 0x4d2   : > { %v490_v26 = vpack.c.bf16 %v489_v25, %v489_v25 }
 0x4d4   : > { %1150 = vmatmul.mubr.msk.bf16.vlgmr.msra.gmra.mxu0 %vm432_vm3, %v490_v26 }
 0x4d5   : > { %1161 = vmatprep.mubr.msk.bf16.mxu0 %vm1464_vm1, %v1463_v8 }
 0x4d7   : > { %v1303_v27 = vpop.eup %1302 }
 0x4d8   : > { %v605_v29 = vmul.f32 %v1303_v27, %v1295_v10 }
 0x4d9   : > { %v843_v28 = vpop.xlane.xlu0 %842 }
 0x4da   : > { %v606_v32 = vpack.c.bf16 %v605_v29, %v605_v29 }
 0x4dd   : > { %v608_v30 = vpop.permute.xlu0 %607 }
 0x4de   : > { %v613_v31 = vsel %vm496_vm4, %v608_v30, 0 }
 0x4df   : > { %1160 = vmatpush3.bf16.msra.mxu0 %v613_v31 }
 0x4e0   : > { %1171 = vmatprep.subr.bf16.mxu0 %v1463_v8 }
 0x4e2   : > { %1162 = vmatmul.mubr.msk.bf16.vlgmr.msra.gmra.mxu0 %vm432_vm3, %v606_v32 }
 0x4e3   : > { %1173 = vmatprep.mubr.msk.bf16.mxu0 %vm1464_vm1, %v1463_v8 }
 0x4f6   : > { %v723_v33 = vpop.xlane.xlu1 %722 }
 0x4f7   : > { %1304 = vrcp.f32 %v723_v33 }
 0x4f8   : > { %1306 = vrcp.f32 %v843_v28 }
 0x4fa   : > { %v728_v34 = vpop.permute.xlu1 %727 }
 0x4fb   : > { %v733_v35 = vsel %vm496_vm4, %v728_v34, 0 }
 0x4fc   : > { %1172 = vmatpush3.bf16.msra.mxu0 %v733_v35 }
 0x4fd   : > { %1183 = vmatprep.subr.bf16.mxu0 %v1463_v8 }
 0x4fe   : > { %v848_v38 = vpop.permute.xlu1 %847 }
 0x4ff   : > { %v853_v41 = vsel %vm496_vm4, %v848_v38, 0 }
 0x504   : > { %v1305_v36 = vpop.eup %1304 }
 0x505   : > { %v725_v37 = vmul.f32 %v1305_v36, %v1299_v18  ;;  %v1307_v40 = vpop.eup %1306 }
 0x506   : > { %v845_v42 = vmul.f32 %v1307_v40, %v1297_v13 }
 0x507   : > { %v726_v39 = vpack.c.bf16 %v725_v37, %v725_v37 }
 0x508   : > { %v846_v43 = vpack.c.bf16 %v845_v42, %v845_v42 }
 0x509   : > { %1174 = vmatmul.mubr.msk.bf16.vlgmr.msra.gmra.mxu0 %vm432_vm3, %v726_v39 }
 0x50a   : > { %1184 = vmatpush3.bf16.msra.mxu0 %v853_v41  ;;  %1185 = vmatprep.mubr.msk.bf16.mxu0 %vm1464_vm1, %v1463_v8 }
 0x511   : > { %1186 = vmatmul.mubr.msk.bf16.vlgmr.msra.gmra.mxu0 %vm432_vm3, %v846_v43 }
 0x594   : > { %v534_v44 = vpop.f32.mrf.mxu0 }
 0x595   : > { %540 = vst.msk [vmem:[#allocation3] sm:$0xff] %vm432_vm3, %v534_v44 }
 0x596   : > { %v1151_v45 = vpop.f32.mrf.mxu0 }
 0x598   : > { %v537_v46 = vpop.f32.mrf.mxu0 }
 0x59a   : > { %v1152_v47 = vpop.f32.mrf.mxu0 }
 0x5a2   : > { %v649_v48 = vpop.f32.mrf.mxu0 }
 0x5a3   : > { %656 = vrot.lane.b32.xlu0 %v649_v48, %s1476_s20 }
 0x5a4   : > { %v1163_v49 = vpop.f32.mrf.mxu0 }
 0x5a6   : > { %v652_v50 = vpop.f32.mrf.mxu0 }
 0x5a8   : > { %v1164_v51 = vpop.f32.mrf.mxu0 }
 0x5c9   : > { %v769_v54 = vpop.f32.mrf.mxu0 }
 0x5ca   : > { %776 = vrot.lane.b32.xlu1 %v769_v54, %s1477_s21 }
 0x5cb   : > { %v1175_v55 = vpop.f32.mrf.mxu0 }
 0x5cd   : > { %v772_v56 = vpop.f32.mrf.mxu0 }
 0x5cf   : > { %v1176_v57 = vpop.f32.mrf.mxu0 }
 0x5d1   : > { %v889_v58 = vpop.f32.mrf.mxu0 }
 0x5d2   : > { %896 = vrot.lane.b32.xlu0 %v889_v58, %s1478_s22 }
 0x5d3   : > { %v1187_v59 = vpop.f32.mrf.mxu0 }
 0x5d5   : > { %v892_v60 = vpop.f32.mrf.mxu0 }
 0x5d7   : > { %v1188_v61 = vpop.f32.mrf.mxu0 }
 0x615   : > { %v657_v62 = vpop.permute.xlu0 %656 }
 0x616   : > { %660 = vst.msk [vmem:[#allocation3] sm:$0xff] %vm659_vm5, %v657_v62 }
 0x63c   : > { %v777_v8 = vpop.permute.xlu1 %776 }
 0x63d   : > { %780 = vst.msk [vmem:[#allocation3] sm:$0xff] %vm779_vm6, %v777_v8 }
 0x644   : > { %v897_v63 = vpop.permute.xlu0 %896 }
 0x645   : > { %900 = vst.msk [vmem:[#allocation3] sm:$0xff] %vm899_vm7, %v897_v63 }
 0x64c   : > { %v901_v0 = vld [vmem:[#allocation3] sm:$0xff] }
 0x64d   : > { %v902_v1 = vpack.c.bf16 %v901_v0, %v901_v0 }
 0x64f   : > { %1194 = vmatmul.mubr.msk.bf16.vlgmr.msra.gmra.mxu1 %vm325_vm0, %v902_v1 }
 0x70f   : > { %v963_v3 = vpop.f32.mrf.mxu1 }
 0x710   : > { %v964_v4 = vadd.f32 %v1103_v2, %v963_v3 }
 0x711   : > { %v1195_v5 = vpop.f32.mrf.mxu1 }
 0x712   : > { %969 = vst.msk [vmem:[%s322_s15] sm:$0xff] %vm325_vm0, %v964_v4 }
 0x713   : > { %v966_v6 = vpop.f32.mrf.mxu1 }
 0x714   : > { %1401 = shalt.err (!%p1398_p9)
}
 0x715   : > { %s1402_s20 = scalar_lea.hbm %s1750_s5, 128  ;;  %s1406_s22 = scalar_lea.hbm %s1801_s7, 256 }
 0x716   : > { %p1403_p13 = scmp.ne.s32.totalorder %s1750_s5, %s1402_s20  ;;  %p1407_p4 = scmp.lt.s32.totalorder %s1750_s5, %s1801_s7 }
 0x717   : > { %p1408_p8 = scmp.lt.s32.totalorder %s1406_s22, %s1402_s20 }
 0x718   : > { %p1404_p5 = pnand %p1403_p13, %p1821_p0 }
 0x719   : > { %p1409_p3 = por %p1408_p8, %p1407_p4 }
 0x71a   : > { %p1405_p10 = pneg %p1404_p5 }
 0x71c   : > { %p1410_p11 = pnand %p1409_p3, %p1405_p10 }
 0x71e   : > { %1413 = shalt.err (!%p1410_p11)
}
 0x71f   : > { %1207 = dma.vmem_to_hbm [thread:$0]  (%p1821_p0), %s1752_s19, 128, %s1750_s5, %s971_s28   ;;  %v1196_v7 = vpop.f32.mrf.mxu1 }
 0x720 PF: > { %s996_s17 = sand.u32 1, %s1444_s24   ;;  %p1822_p1 = scmp.ne.s32.totalorder %s1809_s8, 0 }
 0x721   : > { %p1823_p2 = scmp.ge.s32.totalorder %s1456_s27, 2  ;;  %s997_s15 = scalar_lea.sflag [#allocation6], %s996_s17 }
 0x723   : > { %p1221_p6 = pnand %p1823_p2, %p1822_p1 }
 0x725   : > { %p1222_p12 = pneg %p1221_p6 }
 0x727   : > { %1439 = dma.done.wait (%p1222_p12), %s997_s15, 128  }
 0x728   : > { %1441 = vsyncadd (%p1222_p12), %s997_s15, 4294967168  ;;  %p21_p7 = scmp.ge.s32.totalorder %s1592_s23, 4   ;;  %s1824_s24 = smov %s1448_s25 }
 0x729   : > { %s1825_s25 = smov %s1452_s26  ;;  %s1826_s26 = smov %s1608_s12 }
 0x72a   : > { %s1827_s27 = smov %s1592_s23  ;;  %23 = sbr.rel (!%p21_p7) target bundleno = 9 (0x9), region = 101 }
 0x72f   :  { %1002 = vsyncpa [#allocation5], 1 }
 0x730   :  { %1004 = vsyncpa [#allocation5 + $0x1], 1 }
 0x731   :  { %1005 = vsyncpa [#allocation8], 1 }
 0x732   :  { %1006 = vsyncpa [#allocation6], 1 }
 0x733   :  { %1008 = vsyncpa [#allocation6 + $0x1], 1 }

// kernel: tpu_custom_call.1
= control target key start
LH: loop header
LB: loop body
LE: loop exit
PB: predicated region body
PF: predicated region fallthrough
CT: control target
= control target key end

     0   :  { %s1794_s0 = inlined_call_operand.hbm [shape: f32[2,8,32], index: 0, kind: input, shape index: {}]   ;;  %s1795_s1 = inlined_call_operand.vmem [shape: f32[1,32], index: 1, kind: input, shape index: {}]   ;;  %s1796_s2 = inlined_call_operand.vmem [shape: f32[1,32], index: 2, kind: input, shape index: {}]   ;;  %s1797_s3 = inlined_call_operand.hbm [shape: bf16[32,96], index: 3, kind: input, shape index: {}]   ;;  %s1798_s4 = inlined_call_operand.vmem [shape: f32[1,96], index: 4, kind: input, shape index: {}]   ;;  %s1799_s5 = inlined_call_operand.hbm [shape: bf16[32,32], index: 5, kind: input, shape index: {}]   ;;  %s1800_s6 = inlined_call_operand.vmem [shape: f32[1,32], index: 6, kind: input, shape index: {}]   ;;  %s1801_s7 = inlined_call_operand.hbm [shape: f32[2,8,32], index: 7, kind: output, shape index: {}]  }
   0x1   :  { %1806 = sst [smem:[#allocation14_spill]] %s1797_s3 }
   0x2   :  { %1807 = sst [smem:[#allocation15_spill]] %s1799_s5 }
   0x3   :  { %12 = vsyncpa [#allocation5], 0 }
   0x4   :  { %14 = vsyncpa [#allocation5 + $0x1], 0 }
   0x5   :  { %15 = vsyncpa [#allocation8], 0 }
   0x6   :  { %16 = vsyncpa [#allocation6], 0 }
   0x7   :  { %18 = vsyncpa [#allocation6 + $0x1], 0  ;;  %s1520_s24 = smov 0   ;;  %s1522_s25 = smov 0  }
   0x8   :  { %s1524_s26 = smov 0   ;;  %s1526_s27 = smov 0  }
   0x9 LB: > { %s1541_s28 = sadd.s32 4294967295, %s1456_s27   ;;  %s1073_s29 = sadd.s32 4294967294, %s1456_s27   ;;  %s1456_s27 = sphi %s1526_s27, %s1827_s27   ;;  %s1452_s26 = sphi %s1524_s26, %s1826_s26   ;;  %s1448_s25 = sphi %s1522_s25, %s1825_s25   ;;  %s1444_s24 = sphi %s1520_s24, %s1824_s24  }
   0xa   : > { %p44_p0 = scmp.ne.s32.totalorder %s1448_s25, %s1444_s24  ;;  %p1802_p1 = scmp.eq.s32.totalorder %s1541_s28, 0 }
   0xb   : > { %p200_p3 = scmp.eq.s32.totalorder %s1073_s29, 1  ;;  %p1074_p5 = scmp.ge.s32.totalorder %s1456_s27, 1 }
   0xc   : > { %p1550_p4 = por %p1802_p1, %p44_p0  ;;  %p207_p7 = scmp.lt.s32.totalorder %s1456_s27, 3 }
   0xd   : > { %p1555_p6 = por %p200_p3, %p44_p0  ;;  %s1458_s10 = smov [#allocation7]  }
   0xe   : > { %s1808_s30 = scalar_select %p1550_p4, 1, 0 }
   0xf   : > { %s1809_s8 = scalar_select %p1555_p6, 1, 0 }
  0x10   : > { %p1560_p8 = pnand %p1074_p5, %p207_p7  ;;  %s225_s11 = sshll.u32 %s1458_s10, 4  ;;  %s226_s11 = int_to_ptr.vmem [resolvable:$true] %s225_s11 }
  0x11   : > { %s1459_s13 = smov [#allocation9]   ;;  %s1319_s15 = scalar_lea.vmem %s226_s11, 256 }
  0x12   : > { %s1810_s9 = scalar_select %p1560_p8, 1, 0 }
  0x13   : > { %p1209_p9 = pneg %p1560_p8  ;;  %s241_s14 = sshll.u32 %s1459_s13, 4  ;;  %s242_s14 = int_to_ptr.vmem [resolvable:$true] %s241_s14 }
  0x14   : > { %p1320_p13 = scmp.ne.s32.totalorder %s226_s11, %s1319_s15  ;;  %p1327_p5 = scmp.lt.s32.totalorder %s226_s11, %s226_s11 }
  0x15   : > { %p1569_p11 = pnand %p1209_p9, %p1802_p1  ;;  %p1328_p7 = scmp.lt.s32.totalorder %s1319_s15, %s1319_s15 }
  0x17   : > { %p1310_p12 = pneg %p1569_p11  ;;  %p1329_p10 = por %p1328_p7, %p1327_p5 }
  0x19   : > { %p1322_p0 = pnand %p1320_p13, %p1310_p12 }
  0x1b   : > { %p1323_p3 = pneg %p1322_p0 }
  0x1d   : > { %p1330_p9 = pnand %p1329_p10, %p1323_p3 }
  0x1f   : > { %1333 = shalt.err (!%p1330_p9)
}
  0x20   : > { %s1460_s16 = smov 64   ;;  %s1461_s17 = smov 4  }
  0x21   : > { %s1812_s3 = sld [smem:[#allocation14_spill]]  ;;  %s1345_s20 = scalar_lea.vmem %s242_s14, 256 }
  0x22   : > { %p1346_p1 = scmp.ne.s32.totalorder %s242_s14, %s1345_s20  ;;  %p1353_p2 = scmp.lt.s32.totalorder %s242_s14, %s242_s14 }
  0x23   : > { %p1354_p6 = scmp.lt.s32.totalorder %s1345_s20, %s1345_s20 }
  0x24   : > { %p1348_p13 = pnand %p1346_p1, %p1310_p12 }
  0x25   : > { %p1355_p5 = por %p1354_p6, %p1353_p2 }
  0x26   : > { %p1349_p0 = pneg %p1348_p13 }
  0x27   : > { %1212 = dma.hbm_to_vmem [thread:$0]  (!%p1569_p11), %s1812_s3, 256, %s226_s11, [#allocation8], %s1460_s16, %s1460_s16, %s1461_s17  }
  0x28   : > { %p1356_p10 = pnand %p1355_p5, %p1349_p0 }
  0x2a   : > { %1359 = shalt.err (!%p1356_p10)
}
  0x2b   : > { %s1813_s5 = sld [smem:[#allocation15_spill]]  ;;  %s1592_s23 = sadd.s32 1, %s1456_s27  }
  0x2c   : > { %s31_s29 = sadd.s32 1, %s1452_s26  ;;  %s28_s10 = ssub.s32 %s1456_s27, %s1592_s23 }
  0x2d   : > { %p38_p1 = scmp.ne.s32.totalorder %s1452_s26, %s1448_s25  ;;  %p29_p2 = scmp.eq.s32.totalorder %s28_s10, 0 }
  0x2e   : > { %p39_p6 = scmp.eq.s32.totalorder %s1456_s27, 0  ;;  %p1814_p12 = scmp.eq.s32.totalorder %s1541_s28, 1 }
  0x2f   : > { %p1226_p7 = scmp.lt.s32.totalorder %s1456_s27, 2  ;;  %s258_s13 = sand.u32 1, %s1452_s26  }
  0x30   : > { %p1602_p3 = por %p1814_p12, %p38_p1  ;;  %p40_p9 = por %p39_p6, %p38_p1 }
  0x31   : > { %1215 = dma.hbm_to_vmem [thread:$0]  (!%p1569_p11), %s1813_s5, 256, %s242_s14, [#allocation8], %s1460_s16, %s1460_s16, %s1461_s17  }
  0x32   : > { %s1815_s11 = scalar_select %p1602_p3, 1, 0 }
  0x33   : > { %s1608_s12 = scalar_select %p29_p2, %s1452_s26, %s31_s29  }
  0x34   : > { %s1078_s15 = sshll.u32 %s258_s13, 3  ;;  %s1079_s14 = sshll.u32 %s1456_s27, 7 }
  0x35   : > { %s1615_s18 = scalar_lea.hbm %s1794_s0, %s1079_s14  ;;  %s262_s19 = scalar_lea.vmem [#allocation4], %s1078_s15 }
  0x36   : > { %s269_s20 = sshll.u32 %s262_s19, 4  ;;  %p1617_p11 = pnand %p1226_p7, %p40_p9  ;;  %s270_s20 = int_to_ptr.vmem [resolvable:$true] %s269_s20 }
  0x37   : > { %s259_s22 = scalar_lea.sflag [#allocation5], %s258_s13  ;;  %s1360_s29 = scalar_lea.hbm %s1615_s18, 128 }
  0x38   : > { %p1361_p13 = scmp.ne.s32.totalorder %s1615_s18, %s1360_s29  ;;  %p1362_p0 = pneg %p1617_p11 }
  0x39   : > { %s1365_s16 = scalar_lea.hbm %s1794_s0, 256  ;;  %p1366_p1 = scmp.lt.s32.totalorder %s1615_s18, %s1794_s0 }
  0x3a   : > { %p1363_p5 = pnand %p1362_p0, %p1361_p13  ;;  %p1367_p2 = scmp.lt.s32.totalorder %s1365_s16, %s1360_s29 }
  0x3c   : > { %p1364_p10 = pneg %p1363_p5  ;;  %p1368_p6 = por %p1367_p2, %p1366_p1 }
  0x3e   : > { %p1369_p12 = pnand %p1368_p6, %p1364_p10 }
  0x40   : > { %1372 = shalt.err (!%p1369_p12)
}
  0x41   : > { %s1373_s19 = scalar_lea.vmem %s270_s20, 128  ;;  %s1462_s13 = smov [#allocation4]  }
  0x42   : > { %p1374_p7 = scmp.ne.s32.totalorder %s270_s20, %s1373_s19  ;;  %s1378_s3 = sshll.u32 %s1462_s13, 4  ;;  %s1379_s3 = int_to_ptr.vmem [resolvable:$false] %s1378_s3 }
  0x43   : > { %s1380_s5 = scalar_lea.vmem %s1379_s3, 256  ;;  %p1381_p13 = scmp.lt.s32.totalorder %s270_s20, %s1379_s3 }
  0x44   : > { %p1376_p9 = pnand %p1374_p7, %p1362_p0  ;;  %p1382_p5 = scmp.lt.s32.totalorder %s1380_s5, %s1373_s19 }
  0x46   : > { %p1377_p3 = pneg %p1376_p9  ;;  %p1383_p4 = por %p1382_p5, %p1381_p13 }
  0x48   : > { %p1384_p8 = pnand %p1383_p4, %p1377_p3 }
  0x4a   : > { %1387 = shalt.err (!%p1384_p8)
}
  0x4b   : > { %1219 = dma.hbm_to_vmem [thread:$0]  (!%p1617_p11), %s1615_s18, 128, %s270_s20, %s259_s22  }
  0x4c   : > { %p1817_p10 = scmp.ne.s32.totalorder %s1810_s9, 0 }
  0x4d   : > { %s1638_s29 = sand.u32 (!%p1817_p10), 1, %s1448_s25   ;;  %p1818_p4 = scmp.ne.s32.totalorder (!%p1817_p10), %s1808_s30, 0 }
  0x4e   : > { %278 = sbr.rel (%p1817_p10) target bundleno = 1824 (0x720), region = 48  ;;  %s1081_s10 = sshll.u32 (!%p1817_p10), %s1638_s29, 3 }
  0x4f   : > { %s281_s3 = scalar_lea.sflag (!%p1817_p10), [#allocation5], %s1638_s29  ;;  %s284_s5 = scalar_lea.vmem (!%p1817_p10), [#allocation4], %s1081_s10 }
  0x53   : > { %1431 = dma.done.wait (%p1818_p4), %s281_s3, 128  }
  0x54   : > { %1433 = vsyncadd (%p1818_p4), %s281_s3, 4294967168  ;;  %p1819_p8 = scmp.eq.s32.totalorder %s1541_s28, 0 }
  0x56   : > { %1435 = dma.done.wait (%p1819_p8), [#allocation8], 512   ;;  %p1820_p3 = pmov %p1819_p8 }
  0x57   : > { %vm325_vm0 = vcmask 261120   ;;  %v324_v0 = vld [vmem:[%s284_s5] sm:$0xff]  ;;  %v1282_v7 = vld [vmem:[#allocation7 + $0x8] sm:$0xff]   ;;  %v1463_v8 = vmov 0.0   ;;  %vm1464_vm1 = vmmov 0   ;;  %v1283_v9 = vld [vmem:[#allocation7] sm:$0xff]  }
  0x58   : > { %1437 = vsyncadd (%p1820_p3), [#allocation8], 4294966784  ;;  %v326_v1 = vsel %vm325_vm0, %v324_v0, 0.0  ;;  %1133 = vmatprep.subr.bf16.mxu0 %v1463_v8  ;;  %1137 = vmatprep.mubr.msk.bf16.mxu0 %vm1464_vm1, %v1463_v8  ;;  %v1085_v14 = vld [vmem:[%s1795_s1] ss:$0 sm:$0xff]  ;;  %vm424_vm2 = vcmask 781312  }
  0x59   : > { %327 = vadd.xlane.f32.xlu0 %v326_v1  ;;  %1134 = vmatpush3.bf16.msra.mxu0 %v1282_v7  ;;  %v1086_v16 = vld [vmem:[%s1796_s2] ss:$0 sm:$0xff]  ;;  %s1465_s14 = smov 120   ;;  %s1466_s16 = smov 96   ;;  %vm432_vm3 = vcmask 64512   ;;  %vm496_vm4 = vcmask 1043456  }
  0x5a   : > { %1141 = vmatprep.subr.bf16.mxu1 %v1463_v8  ;;  %1135 = vmatprep.subr.bf16.mxu0 %v1463_v8  ;;  %v1087_v20 = vld [vmem:[%s1798_s4] ss:$0 sm:$0xff]  ;;  %s1467_s17 = smov 88   ;;  %s1468_s15 = smov 80   ;;  %vm659_vm5 = vcmask 130112   ;;  %vm779_vm6 = vcmask 195712  }
  0x5b   : > { %1143 = vmatprep.mubr.msk.bf16.mxu1 %vm1464_vm1, %v1463_v8  ;;  %s1469_s19 = smov 112   ;;  %s1470_s13 = smov 72   ;;  %vm899_vm7 = vcmask 261312  }
  0x5c   : > { %s1471_s3 = smov 104   ;;  %s1472_s5 = smov 64  }
  0x5d   : > { %1136 = vmatpush3.bf16.msra.mxu0 %v1283_v9  ;;  %s1473_s30 = smov 56   ;;  %s1474_s9 = smov 48  }
  0x5e   : > { %1147 = vmatprep.subr.bf16.mxu0 %v1463_v8  ;;  %s1475_s18 = smov 40   ;;  %s1476_s20 = smov 8  }
  0x5f   : > { %s1477_s21 = smov 16   ;;  %s1478_s22 = smov 24  }
  0x60   : > { %p1821_p0 = scmp.ne.s32.totalorder %s1815_s11, 0 }
  0xe2   : > { %v328_v2 = vpop.xlane.xlu0 %327 }
  0xe3   : > { %v330_v3 = vmul.f32 0.03125, %v328_v2 }
  0xe5   : > { %v331_v4 = vsub.f32 %v324_v0, %v330_v3 }
  0xe7   : > { %v332_v5 = vmul.f32 %v331_v4, %v331_v4 }
  0xe9   : > { %v333_v6 = vsel %vm325_vm0, %v332_v5, 0.0 }
  0xea   : > { %334 = vadd.xlane.f32.xlu0 %v333_v6 }
 0x173   : > { %v335_v10 = vpop.xlane.xlu0 %334 }
 0x174   : > { %v336_v11 = vmul.f32 0.03125, %v335_v10 }
 0x176   : > { %v337_v12 = vadd.f32 1e-05, %v336_v11 }
 0x178   : > { %1290 = vrsqrt.f32 %v337_v12 }
 0x185   : > { %v1291_v13 = vpop.eup %1290 }
 0x186   : > { %v339_v15 = vmul.f32 %v1291_v13, %v331_v4 }
 0x188   : > { %v347_v17 = vmul.f32 %v1085_v14, %v339_v15 }
 0x18a   : > { %v355_v18 = vadd.f32 %v1086_v16, %v347_v17 }
 0x18c   : > { %v356_v19 = vpack.c.bf16 %v355_v18, %v355_v18 }
 0x18e   : > { %1138 = vmatmul.mubr.msk.bf16.vlgmr.msra.gmra.mxu0 %vm325_vm0, %v356_v19 }
 0x18f   : > { %1149 = vmatprep.mubr.msk.bf16.mxu0 %vm1464_vm1, %v1463_v8 }
 0x24e   : > { %v417_v21 = vpop.f32.mrf.mxu0 }
 0x24f   : > { %v418_v22 = vadd.f32 %v1087_v20, %v417_v21 }
 0x250   : > { %v1139_v23 = vpop.f32.mrf.mxu0 }
 0x251   : > { %v423_v24 = vpack.c.bf16 %v418_v22, %v418_v22 }
 0x252   : > { %v420_v25 = vpop.f32.mrf.mxu0 }
 0x253   : > { %425 = vst.msk [vmem:[#allocation2] sm:$0xf] %vm424_vm2, %v423_v24 }
 0x254   : > { %v1140_v26 = vpop.f32.mrf.mxu0 }
 0x25a   : > { %v1674_v27 = vld [vmem:[#allocation2] ss:$0 sps:$4 sm:$0xff]  }
 0x25b   : > { %v426_v28 = vld [vmem:[#allocation2] sm:$0xf]  ;;  %545 = vrot.lane.b32.xlu0 %v1674_v27, %s1465_s14 }
 0x25c   : > { %v1676_v29 = vcombine.low %v426_v28, %v426_v28  ;;  %v1681_v30 = vld [vmem:[#allocation2] ss:$0 sps:$4 sm:$0xff]  }
 0x25d   : > { %v1685_v31 = vld [vmem:[#allocation2] ss:$0 sps:$4 sm:$0xff]  }
 0x25e   : > { %430 = vrot.lane.b32.xlu1 %v1676_v29, %s1466_s16 }
 0x262   : > { %547 = vrot.lane.b32.xlu1 %v1674_v27, %s1467_s17  ;;  %s1108_s17 = sshll.u32 %s1541_s28, 7  ;;  %s971_s28 = scalar_lea.sflag [#allocation6], %s1638_s29 }
 0x266   : > { %667 = vrot.lane.b32.xlu1 %v1681_v30, %s1468_s15  ;;  %s322_s15 = scalar_lea.vmem [#allocation10], %s1081_s10  ;;  %s1479_s10 = smov [#allocation10]  }
 0x26a   : > { %665 = vrot.lane.b32.xlu1 %v1681_v30, %s1469_s19  ;;  %s984_s19 = sshll.u32 %s322_s15, 4  ;;  %s1752_s19 = int_to_ptr.vmem [resolvable:$true] %s984_s19 }
 0x26e   : > { %787 = vrot.lane.b32.xlu1 %v1685_v31, %s1470_s13 }
 0x272   : > { %785 = vrot.lane.b32.xlu1 %v1685_v31, %s1471_s3 }
 0x2cd   : > { %v546_v37 = vpop.permute.xlu0 %545 }
 0x2d0   : > { %v431_v32 = vpop.permute.xlu1 %430 }
 0x2d1   : > { %v437_v33 = vsel %vm432_vm3, %v431_v32, 0 }
 0x2d2   : > { %1142 = vmatpush3.bf16.xpose.msra.mxu1 %v437_v33 }
 0x2d3   : > { %1153 = vmatprep.subr.bf16.mxu1 %v1463_v8 }
 0x2d4   : > { %v548_v34 = vpop.permute.xlu1 %547 }
 0x2d5   : > { %v553_v35 = vsel %vm432_vm3, %v548_v34, 0 }
 0x2d8   : > { %v668_v36 = vpop.permute.xlu1 %667 }
 0x2d9   : > { %1144 = vmatmul.mubr.msk.bf16.vlgmr.msra.gmra.mxu1 %vm432_vm3, %v426_v28  ;;  %v673_v39 = vsel %vm432_vm3, %v668_v36, 0 }
 0x2da   : > { %1154 = vmatpush3.bf16.xpose.msra.mxu1 %v553_v35  ;;  %1155 = vmatprep.mubr.msk.bf16.mxu1 %vm1464_vm1, %v1463_v8 }
 0x2db   : > { %1165 = vmatprep.subr.bf16.mxu1 %v1463_v8 }
 0x2dc   : > { %v666_v38 = vpop.permute.xlu1 %665 }
 0x2e0   : > { %v788_v40 = vpop.permute.xlu1 %787 }
 0x2e1   : > { %1156 = vmatmul.mubr.msk.bf16.vlgmr.msra.gmra.mxu1 %vm432_vm3, %v546_v37  ;;  %v793_v41 = vsel %vm432_vm3, %v788_v40, 0 }
 0x2e2   : > { %1166 = vmatpush3.bf16.xpose.msra.mxu1 %v673_v39  ;;  %1167 = vmatprep.mubr.msk.bf16.mxu1 %vm1464_vm1, %v1463_v8 }
 0x2e3   : > { %1177 = vmatprep.subr.bf16.mxu1 %v1463_v8 }
 0x2e4   : > { %v786_v42 = vpop.permute.xlu1 %785 }
 0x2e9   : > { %1168 = vmatmul.mubr.msk.bf16.vlgmr.msra.gmra.mxu1 %vm432_vm3, %v666_v38 }
 0x2ea   : > { %1178 = vmatpush3.bf16.xpose.msra.mxu1 %v793_v41  ;;  %1179 = vmatprep.mubr.msk.bf16.mxu1 %vm1464_vm1, %v1463_v8 }
 0x2eb   : > { %1189 = vmatprep.subr.bf16.mxu1 %v1463_v8 }
 0x2f1   : > { %1180 = vmatmul.mubr.msk.bf16.vlgmr.msra.gmra.mxu1 %vm432_vm3, %v786_v42 }
 0x2f2   : > { %1193 = vmatprep.mubr.msk.bf16.mxu1 %vm1464_vm1, %v1463_v8 }
 0x399   : > { %v473_v43 = vpop.f32.mrf.mxu1 }
 0x39a   : > { %v479_v44 = vsel %vm432_vm3, %v473_v43, -inf }
 0x39b   : > { %480 = vmax.xlane.f32.xlu1 %v479_v44  ;;  %v1145_v45 = vpop.f32.mrf.mxu1 }
 0x39d   : > { %v476_v46 = vpop.f32.mrf.mxu1 }
 0x39f   : > { %v1146_v47 = vpop.f32.mrf.mxu1 }
 0x3a1   : > { %v589_v48 = vpop.f32.mrf.mxu1 }
 0x3a2   : > { %v595_v49 = vsel %vm432_vm3, %v589_v48, -inf }
 0x3a3   : > { %596 = vmax.xlane.f32.xlu0 %v595_v49  ;;  %v1157_v50 = vpop.f32.mrf.mxu1 }
 0x3a5   : > { %v592_v51 = vpop.f32.mrf.mxu1 }
 0x3a7   : > { %v1158_v52 = vpop.f32.mrf.mxu1 }
 0x3a8   : > { %v1288_v52 = vld [vmem:[#allocation9 + $0x8] sm:$0xff]  }
 0x3a9   : > { %v709_v53 = vpop.f32.mrf.mxu1  ;;  %1190 = vmatpush3.bf16.msra.mxu1 %v1288_v52 }
 0x3aa   : > { %v715_v54 = vsel %vm432_vm3, %v709_v53, -inf  ;;  %1191 = vmatprep.subr.bf16.mxu1 %v1463_v8 }
 0x3ab   : > { %716 = vmax.xlane.f32.xlu1 %v715_v54  ;;  %v1169_v55 = vpop.f32.mrf.mxu1 }
 0x3ad   : > { %v712_v56 = vpop.f32.mrf.mxu1 }
 0x3af   : > { %v1170_v57 = vpop.f32.mrf.mxu1 }
 0x3b1   : > { %v829_v58 = vpop.f32.mrf.mxu1 }
 0x3b2   : > { %v835_v59 = vsel %vm432_vm3, %v829_v58, -inf }
 0x3b3   : > { %836 = vmax.xlane.f32.xlu0 %v835_v59  ;;  %v1181_v60 = vpop.f32.mrf.mxu1 }
 0x3b5   : > { %v832_v61 = vpop.f32.mrf.mxu1 }
 0x3b7   : > { %v1182_v62 = vpop.f32.mrf.mxu1 }
 0x424   : > { %v481_v63 = vpop.xlane.xlu1 %480 }
 0x425   : > { %v482_v0 = vsub.f32 %v473_v43, %v481_v63 }
 0x427   : > { %v483_v1 = vmul.f32 1.442695, %v482_v0 }
 0x429   : > { %1292 = vpow2.f32 %v483_v1 }
 0x42c   : > { %v597_v2 = vpop.xlane.xlu0 %596 }
 0x42d   : > { %v598_v3 = vsub.f32 %v589_v48, %v597_v2  ;;  %v1103_v2 = vld [vmem:[%s1800_s6] ss:$0 sm:$0xff] }
 0x42f   : > { %v599_v4 = vmul.f32 1.442695, %v598_v3 }
 0x431   : > { %1294 = vpow2.f32 %v599_v4 }
 0x434   : > { %v717_v15 = vpop.xlane.xlu1 %716 }
 0x435   : > { %v718_v16 = vsub.f32 %v709_v53, %v717_v15  ;;  %v1289_v53 = vld [vmem:[#allocation9] sm:$0xff]  }
 0x436   : > { %v1293_v5 = vpop.eup %1292  ;;  %1192 = vmatpush3.bf16.msra.mxu1 %v1289_v53 }
 0x437   : > { %v485_v6 = vsel %vm432_vm3, %v1293_v5, 0.0  ;;  %v719_v17 = vmul.f32 1.442695, %v718_v16 }
 0x438   : > { %486 = vadd.xlane.f32.xlu1 %v485_v6 }
 0x43c   : > { %v837_v7 = vpop.xlane.xlu0 %836 }
 0x43d   : > { %v838_v9 = vsub.f32 %v829_v58, %v837_v7 }
 0x43e   : > { %v1295_v10 = vpop.eup %1294 }
 0x43f   : > { %v839_v11 = vmul.f32 1.442695, %v838_v9  ;;  %v601_v12 = vsel %vm432_vm3, %v1295_v10, 0.0 }
 0x440   : > { %602 = vadd.xlane.f32.xlu0 %v601_v12 }
 0x441   : > { %1296 = vpow2.f32 %v839_v11 }
 0x442   : > { %1298 = vpow2.f32 %v719_v17 }
 0x449   : > { %491 = vrot.lane.b32.xlu1 %v1676_v29, %s1472_s5  ;;  %s1750_s5 = scalar_lea.hbm %s1801_s7, %s1108_s17 }
 0x44e   : > { %v1297_v13 = vpop.eup %1296 }
 0x44f   : > { %v841_v14 = vsel %vm432_vm3, %v1297_v13, 0.0  ;;  %v1299_v18 = vpop.eup %1298 }
 0x450   : > { %842 = vadd.xlane.f32.xlu0 %v841_v14  ;;  %v721_v19 = vsel %vm432_vm3, %v1299_v18, 0.0 }
 0x466   : > { %607 = vrot.lane.b32.xlu0 %v1674_v27, %s1473_s30  ;;  %s1388_s30 = scalar_lea.vmem %s1752_s19, 128 }
 0x467   : > { %p1389_p11 = scmp.ne.s32.totalorder %s1752_s19, %s1388_s30 }
 0x469   : > { %p1390_p1 = pnand %p1389_p11, %p1821_p0 }
 0x46b   : > { %p1391_p2 = pneg %p1390_p1 }
 0x46d   : > { %722 = vadd.xlane.f32.xlu1 %v721_v19 }
 0x47e   : > { %727 = vrot.lane.b32.xlu1 %v1681_v30, %s1474_s9  ;;  %s1392_s9 = sshll.u32 %s1479_s10, 4  ;;  %s1393_s9 = int_to_ptr.vmem [resolvable:$false] %s1392_s9 }
 0x47f   : > { %p1395_p6 = scmp.lt.s32.totalorder %s1752_s19, %s1393_s9 }
 0x482   : > { %847 = vrot.lane.b32.xlu1 %v1685_v31, %s1475_s18  ;;  %s1394_s18 = scalar_lea.vmem %s1393_s9, 256 }
 0x483   : > { %p1396_p12 = scmp.lt.s32.totalorder %s1394_s18, %s1388_s30 }
 0x485   : > { %p1397_p7 = por %p1396_p12, %p1395_p6 }
 0x487   : > { %p1398_p9 = pnand %p1397_p7, %p1391_p2 }
 0x4c1   : > { %v487_v20 = vpop.xlane.xlu1 %486 }
 0x4c2   : > { %1300 = vrcp.f32 %v487_v20 }
 0x4c5   : > { %v492_v21 = vpop.permute.xlu1 %491 }
 0x4c6   : > { %v498_v22 = vsel %vm496_vm4, %v492_v21, 0 }
 0x4c7   : > { %1148 = vmatpush3.bf16.msra.mxu0 %v498_v22 }
 0x4c8   : > { %1159 = vmatprep.subr.bf16.mxu0 %v1463_v8 }
 0x4c9   : > { %v603_v23 = vpop.xlane.xlu0 %602 }
 0x4ca   : > { %1302 = vrcp.f32 %v603_v23 }
 0x4cf   : > { %v1301_v24 = vpop.eup %1300 }
 0x4d0   : > { %v489_v25 = vmul.f32 %v1301_v24, %v1293_v5 }
 0x4d2   : > { %v490_v26 = vpack.c.bf16 %v489_v25, %v489_v25 }
 0x4d4   : > { %1150 = vmatmul.mubr.msk.bf16.vlgmr.msra.gmra.mxu0 %vm432_vm3, %v490_v26 }
 0x4d5   : > { %1161 = vmatprep.mubr.msk.bf16.mxu0 %vm1464_vm1, %v1463_v8 }
 0x4d7   : > { %v1303_v27 = vpop.eup %1302 }
 0x4d8   : > { %v605_v29 = vmul.f32 %v1303_v27, %v1295_v10 }
 0x4d9   : > { %v843_v28 = vpop.xlane.xlu0 %842 }
 0x4da   : > { %v606_v32 = vpack.c.bf16 %v605_v29, %v605_v29 }
 0x4dd   : > { %v608_v30 = vpop.permute.xlu0 %607 }
 0x4de   : > { %v613_v31 = vsel %vm496_vm4, %v608_v30, 0 }
 0x4df   : > { %1160 = vmatpush3.bf16.msra.mxu0 %v613_v31 }
 0x4e0   : > { %1171 = vmatprep.subr.bf16.mxu0 %v1463_v8 }
 0x4e2   : > { %1162 = vmatmul.mubr.msk.bf16.vlgmr.msra.gmra.mxu0 %vm432_vm3, %v606_v32 }
 0x4e3   : > { %1173 = vmatprep.mubr.msk.bf16.mxu0 %vm1464_vm1, %v1463_v8 }
 0x4f6   : > { %v723_v33 = vpop.xlane.xlu1 %722 }
 0x4f7   : > { %1304 = vrcp.f32 %v723_v33 }
 0x4f8   : > { %1306 = vrcp.f32 %v843_v28 }
 0x4fa   : > { %v728_v34 = vpop.permute.xlu1 %727 }
 0x4fb   : > { %v733_v35 = vsel %vm496_vm4, %v728_v34, 0 }
 0x4fc   : > { %1172 = vmatpush3.bf16.msra.mxu0 %v733_v35 }
 0x4fd   : > { %1183 = vmatprep.subr.bf16.mxu0 %v1463_v8 }
 0x4fe   : > { %v848_v38 = vpop.permute.xlu1 %847 }
 0x4ff   : > { %v853_v41 = vsel %vm496_vm4, %v848_v38, 0 }
 0x504   : > { %v1305_v36 = vpop.eup %1304 }
 0x505   : > { %v725_v37 = vmul.f32 %v1305_v36, %v1299_v18  ;;  %v1307_v40 = vpop.eup %1306 }
 0x506   : > { %v845_v42 = vmul.f32 %v1307_v40, %v1297_v13 }
 0x507   : > { %v726_v39 = vpack.c.bf16 %v725_v37, %v725_v37 }
 0x508   : > { %v846_v43 = vpack.c.bf16 %v845_v42, %v845_v42 }
 0x509   : > { %1174 = vmatmul.mubr.msk.bf16.vlgmr.msra.gmra.mxu0 %vm432_vm3, %v726_v39 }
 0x50a   : > { %1184 = vmatpush3.bf16.msra.mxu0 %v853_v41  ;;  %1185 = vmatprep.mubr.msk.bf16.mxu0 %vm1464_vm1, %v1463_v8 }
 0x511   : > { %1186 = vmatmul.mubr.msk.bf16.vlgmr.msra.gmra.mxu0 %vm432_vm3, %v846_v43 }
 0x594   : > { %v534_v44 = vpop.f32.mrf.mxu0 }
 0x595   : > { %540 = vst.msk [vmem:[#allocation3] sm:$0xff] %vm432_vm3, %v534_v44 }
 0x596   : > { %v1151_v45 = vpop.f32.mrf.mxu0 }
 0x598   : > { %v537_v46 = vpop.f32.mrf.mxu0 }
 0x59a   : > { %v1152_v47 = vpop.f32.mrf.mxu0 }
 0x5a2   : > { %v649_v48 = vpop.f32.mrf.mxu0 }
 0x5a3   : > { %656 = vrot.lane.b32.xlu0 %v649_v48, %s1476_s20 }
 0x5a4   : > { %v1163_v49 = vpop.f32.mrf.mxu0 }
 0x5a6   : > { %v652_v50 = vpop.f32.mrf.mxu0 }
 0x5a8   : > { %v1164_v51 = vpop.f32.mrf.mxu0 }
 0x5c9   : > { %v769_v54 = vpop.f32.mrf.mxu0 }
 0x5ca   : > { %776 = vrot.lane.b32.xlu1 %v769_v54, %s1477_s21 }
 0x5cb   : > { %v1175_v55 = vpop.f32.mrf.mxu0 }
 0x5cd   : > { %v772_v56 = vpop.f32.mrf.mxu0 }
 0x5cf   : > { %v1176_v57 = vpop.f32.mrf.mxu0 }
 0x5d1   : > { %v889_v58 = vpop.f32.mrf.mxu0 }
 0x5d2   : > { %896 = vrot.lane.b32.xlu0 %v889_v58, %s1478_s22 }
 0x5d3   : > { %v1187_v59 = vpop.f32.mrf.mxu0 }
 0x5d5   : > { %v892_v60 = vpop.f32.mrf.mxu0 }
 0x5d7   : > { %v1188_v61 = vpop.f32.mrf.mxu0 }
 0x615   : > { %v657_v62 = vpop.permute.xlu0 %656 }
 0x616   : > { %660 = vst.msk [vmem:[#allocation3] sm:$0xff] %vm659_vm5, %v657_v62 }
 0x63c   : > { %v777_v8 = vpop.permute.xlu1 %776 }
 0x63d   : > { %780 = vst.msk [vmem:[#allocation3] sm:$0xff] %vm779_vm6, %v777_v8 }
 0x644   : > { %v897_v63 = vpop.permute.xlu0 %896 }
 0x645   : > { %900 = vst.msk [vmem:[#allocation3] sm:$0xff] %vm899_vm7, %v897_v63 }
 0x64c   : > { %v901_v0 = vld [vmem:[#allocation3] sm:$0xff] }
 0x64d   : > { %v902_v1 = vpack.c.bf16 %v901_v0, %v901_v0 }
 0x64f   : > { %1194 = vmatmul.mubr.msk.bf16.vlgmr.msra.gmra.mxu1 %vm325_vm0, %v902_v1 }
 0x70f   : > { %v963_v3 = vpop.f32.mrf.mxu1 }
 0x710   : > { %v964_v4 = vadd.f32 %v1103_v2, %v963_v3 }
 0x711   : > { %v1195_v5 = vpop.f32.mrf.mxu1 }
 0x712   : > { %969 = vst.msk [vmem:[%s322_s15] sm:$0xff] %vm325_vm0, %v964_v4 }
 0x713   : > { %v966_v6 = vpop.f32.mrf.mxu1 }
 0x714   : > { %1401 = shalt.err (!%p1398_p9)
}
 0x715   : > { %s1402_s20 = scalar_lea.hbm %s1750_s5, 128  ;;  %s1406_s22 = scalar_lea.hbm %s1801_s7, 256 }
 0x716   : > { %p1403_p13 = scmp.ne.s32.totalorder %s1750_s5, %s1402_s20  ;;  %p1407_p4 = scmp.lt.s32.totalorder %s1750_s5, %s1801_s7 }
 0x717   : > { %p1408_p8 = scmp.lt.s32.totalorder %s1406_s22, %s1402_s20 }
 0x718   : > { %p1404_p5 = pnand %p1403_p13, %p1821_p0 }
 0x719   : > { %p1409_p3 = por %p1408_p8, %p1407_p4 }
 0x71a   : > { %p1405_p10 = pneg %p1404_p5 }
 0x71c   : > { %p1410_p11 = pnand %p1409_p3, %p1405_p10 }
 0x71e   : > { %1413 = shalt.err (!%p1410_p11)
}
 0x71f   : > { %1207 = dma.vmem_to_hbm [thread:$0]  (%p1821_p0), %s1752_s19, 128, %s1750_s5, %s971_s28   ;;  %v1196_v7 = vpop.f32.mrf.mxu1 }
 0x720 PF: > { %s996_s17 = sand.u32 1, %s1444_s24   ;;  %p1822_p1 = scmp.ne.s32.totalorder %s1809_s8, 0 }
 0x721   : > { %p1823_p2 = scmp.ge.s32.totalorder %s1456_s27, 2  ;;  %s997_s15 = scalar_lea.sflag [#allocation6], %s996_s17 }
 0x723   : > { %p1221_p6 = pnand %p1823_p2, %p1822_p1 }
 0x725   : > { %p1222_p12 = pneg %p1221_p6 }
 0x727   : > { %1439 = dma.done.wait (%p1222_p12), %s997_s15, 128  }
 0x728   : > { %1441 = vsyncadd (%p1222_p12), %s997_s15, 4294967168  ;;  %p21_p7 = scmp.ge.s32.totalorder %s1592_s23, 4   ;;  %s1824_s24 = smov %s1448_s25 }
 0x729   : > { %s1825_s25 = smov %s1452_s26  ;;  %s1826_s26 = smov %s1608_s12 }
 0x72a   : > { %s1827_s27 = smov %s1592_s23  ;;  %23 = sbr.rel (!%p21_p7) target bundleno = 9 (0x9), region = 101 }
 0x72f   :  { %1002 = vsyncpa [#allocation5], 1 }
 0x730   :  { %1004 = vsyncpa [#allocation5 + $0x1], 1 }
 0x731   :  { %1005 = vsyncpa [#allocation8], 1 }
 0x732   :  { %1006 = vsyncpa [#allocation6], 1 }
 0x733   :  { %1008 = vsyncpa [#allocation6 + $0x1], 1 }

</bundles_post_ra>
